<compile_context>
chip_gen: v5e
topology: v5e:2x2
jax: 0.10.0
libtpu: 0.0.40
codegen_flags: <defaults>
</compile_context>

<pallas_src>
import jax
import jax.numpy as jnp
from jax.experimental import pallas as pl
from jax.experimental.pallas import tpu as pltpu

# Small, module-consistent sizes (original: ESM_DIM=1280 -> X_DIM=2560,
# HIDDEN=1000 padded to 1024 at deployment).
ESM_DIM = 64
X_DIM = 2 * ESM_DIM          # lane-aligned ESM part of the input
Z_DIM = 2                    # charge + mass columns
HIDDEN = 128                 # multiple of 128 -> (8,128)-clean tiles
OUT_DIM = 1
OUT_PAD = 128                # lane-dense padding of the final layer / output
N_LAYERS = 10
N_HIDDEN_MM = N_LAYERS - 2   # layers 2..9: full H x H matmuls
TILE_GRAN = 16               # batch-tile granularity (bf16 sublane friendly)

assert HIDDEN % 128 == 0 and X_DIM % 128 == 0 and HIDDEN >= OUT_PAD


def _round_up(n, m):
    return ((n + m - 1) // m) * m


# ---------------------------------------------------------------------------
# Kernel
# ---------------------------------------------------------------------------
def _mlp_kernel(x_ref, z_ref, w1a_ref, w1b_ref, wh_ref, w10_ref, b_ref, out_ref):
    """One batch tile of the full 10-layer MLP.

    x_ref   : (TB, X_DIM)        bf16  ESM part of the input
    z_ref   : (TB, Z_DIM)        f32   charge + mass columns
    w1a_ref : (X_DIM, H)         bf16  layer-1 ESM weight (MXU)
    w1b_ref : (Z_DIM, H)         f32   layer-1 z/mass weight (rank-1 VPU terms)
    wh_ref  : (8, H, H)          bf16  stacked layer 2..9 weights
    w10_ref : (H, OUT_PAD)       bf16  layer-10 weight zero-padded to 128 lanes
    b_ref   : (N_LAYERS, H)      f32   stacked biases (row 9 padded with zeros)
    out_ref : (TB, OUT_PAD)      f32   lane-dense output block (col 0 is real)
    """
    z = z_ref[...]                                        # (TB, 2) f32

    # Layer 1: ESM part on the MXU (bf16 x bf16 -> f32 accumulate); the two
    # extra input columns become rank-1 VPU terms (no masked K = 2E+2 tile).
    h = jnp.dot(x_ref[...], w1a_ref[...], preferred_element_type=jnp.float32)
    w1b = w1b_ref[...]                                    # (2, H) f32
    h = h + z[:, 0:1] * w1b[0:1, :] + z[:, 1:2] * w1b[1:2, :]
    h = jnp.maximum(h + b_ref[0:1, :], 0.0)

    # Layers 2..9: H x H matmuls, bf16 weights, f32 accumulate + bias + ReLU.
    for i in range(N_HIDDEN_MM):
        h = jnp.dot(h.astype(jnp.bfloat16), wh_ref[i],
                    preferred_element_type=jnp.float32)
        h = jnp.maximum(h + b_ref[i + 1:i + 2, :], 0.0)

    # Layer 10 (H -> 1) as an MXU matmul against the zero-padded W10 so the
    # output block stays lane-dense (unmasked vst); wrapper slices column 0.
    out = jnp.dot(h.astype(jnp.bfloat16), w10_ref[...],
                  preferred_element_type=jnp.float32)
    out_ref[...] = (out + b_ref[N_LAYERS - 1:N_LAYERS, :OUT_PAD]).astype(out_ref.dtype)


# ---------------------------------------------------------------------------
# Chip-adaptive sizing + single-buffer capability probe
# ---------------------------------------------------------------------------
def _chip_budget():
    """Return (vmem_limit_bytes, batch-tile cap) for the local chip."""
    vmem_cap = 128 << 20
    try:
        info = pltpu.get_tpu_info()
        vmem_cap = int(getattr(info, "vmem_capacity_bytes", vmem_cap))
    except Exception:
        pass
    kind = ""
    try:
        kind = jax.devices()[0].device_kind.lower()
    except Exception:
        pass
    if vmem_cap >= (96 << 20):
        vmem_limit = 100 << 20          # v5e/v6e: 128 MiB physical VMEM
    else:
        vmem_limit = 48 << 20           # v7x: 64 MiB per TensorCore
    # v5e's MXU is 128-wide -> M=256 already saturates it and keeps activation
    # scratch small; v6e/v7x (256-wide MXU) benefit from a 512-row tile.
    tile_cap = 256 if "v5" in kind else 512
    return vmem_limit, tile_cap


def _pick_tile(b, tile_cap):
    tile_b = min(tile_cap, _round_up(max(b, 1), TILE_GRAN))
    # Guarantee >= 2 "parallel" grid steps so both TensorCores of a dual-core
    # chip (v7x) get work even when one tile would cover the whole batch.
    n_steps = (b + tile_b - 1) // tile_b
    if b > TILE_GRAN and n_steps < 2:
        tile_b = _round_up((b + 1) // 2, TILE_GRAN)
    return tile_b


_SINGLE_BUFFER_OK = None


def _single_buffer_supported():
    """Explicit capability probe for pl.Buffered(1) resident-weight specs."""
    global _SINGLE_BUFFER_OK
    if _SINGLE_BUFFER_OK is not None:
        return _SINGLE_BUFFER_OK
    if not hasattr(pl, "Buffered"):
        _SINGLE_BUFFER_OK = False
        return False

    def _probe_kernel(w_ref, o_ref):
        o_ref[...] = w_ref[...] * 2.0

    try:
        fn = pl.pallas_call(
            _probe_kernel,
            out_shape=jax.ShapeDtypeStruct((8, 128), jnp.float32),
            grid=(2,),
            in_specs=[pl.BlockSpec((8, 128), lambda i: (0, 0),
                                   pipeline_mode=pl.Buffered(1))],
            out_specs=pl.BlockSpec((8, 128), lambda i: (0, 0)),
        )
        jax.block_until_ready(fn(jnp.ones((8, 128), jnp.float32)))
        _SINGLE_BUFFER_OK = True
    except Exception:
        # Degradation is visible via this flag (weights fall back to the
        # default double-buffered pipeline).
        _SINGLE_BUFFER_OK = False
    return _SINGLE_BUFFER_OK


def _weight_spec(shape, single_buffer):
    ndim = len(shape)
    index_map = lambda i, _n=ndim: (0,) * _n   # block index never changes
    if single_buffer:
        # One resident copy in VMEM (no pointless double buffering).
        return pl.BlockSpec(shape, index_map, pipeline_mode=pl.Buffered(1))
    return pl.BlockSpec(shape, index_map)


# ---------------------------------------------------------------------------
# pallas_call wrapper
# ---------------------------------------------------------------------------
def _call(xp, zp, params, tile_b, vmem_limit, single_buffer):
    bpad = xp.shape[0]
    grid = (bpad // tile_b,)

    weights = [params["w1a"], params["w1b"], params["w_hidden"],
               params["w10"], params["biases"]]

    in_specs = [
        pl.BlockSpec((tile_b, X_DIM), lambda i: (i, 0)),
        pl.BlockSpec((tile_b, Z_DIM), lambda i: (i, 0)),
    ] + [_weight_spec(w.shape, single_buffer) for w in weights]
    out_spec = pl.BlockSpec((tile_b, OUT_PAD), lambda i: (i, 0))

    return pl.pallas_call(
        _mlp_kernel,
        out_shape=jax.ShapeDtypeStruct((bpad, OUT_PAD), jnp.float32),
        grid_spec=pltpu.PrefetchScalarGridSpec(
            num_scalar_prefetch=0,
            grid=grid,
            in_specs=in_specs,
            out_specs=out_spec,
        ),
        compiler_params=pltpu.CompilerParams(
            dimension_semantics=("parallel",),
            vmem_limit_bytes=vmem_limit,
        ),
    )(xp, zp, *weights)


def ccs_predictor_pallas(x, zandmass, params):
    """x: (B, 2*ESM_DIM) f32, zandmass: (B, 2) f32 -> (B, 1) f32."""
    b = x.shape[0]
    vmem_limit, tile_cap = _chip_budget()
    tile_b = _pick_tile(b, tile_cap)
    bpad = _round_up(b, tile_b)

    xb = x.astype(jnp.bfloat16)            # halve the widest HBM->VMEM stream
    z = zandmass.astype(jnp.float32)
    if bpad != b:
        xb = jnp.pad(xb, ((0, bpad - b), (0, 0)))
        z = jnp.pad(z, ((0, bpad - b), (0, 0)))

    out = _call(xb, z, params, tile_b, vmem_limit,
                single_buffer=_single_buffer_supported())
    return out[:b, :OUT_DIM]


# ---------------------------------------------------------------------------
# Parameters + references
# ---------------------------------------------------------------------------
def init_params(key):
    """Deterministic synthetic f32 parameters matching the module's layers.

    PyTorch stores W as (out, in) and computes x @ W.T; here weights are kept
    as (in, out). Returned as plain f32 lists (the "PyTorch-equivalent"
    ground truth); pack_params() builds the kernel-side layout.
    """
    dims = [X_DIM + Z_DIM] + [HIDDEN] * (N_LAYERS - 1) + [OUT_DIM]
    ws, bs = [], []
    for i in range(N_LAYERS):
        key, kw, kb = jax.random.split(key, 3)
        w = jax.random.normal(kw, (dims[i], dims[i + 1]), jnp.float32) / jnp.sqrt(dims[i])
        b = jax.random.normal(kb, (dims[i + 1],), jnp.float32) * 0.01
        ws.append(w)
        bs.append(b)
    return ws, bs


def pack_params(ws, bs):
    """Kernel-side layout: split W1, stack hidden weights/biases, pad W10."""
    w1 = ws[0]
    w10_pad = jnp.zeros((HIDDEN, OUT_PAD), jnp.float32).at[:, :OUT_DIM].set(ws[-1])
    b_stack = jnp.zeros((N_LAYERS, HIDDEN), jnp.float32)
    for i, b in enumerate(bs):
        b_stack = b_stack.at[i, :b.shape[0]].set(b)
    return {
        "w1a": w1[:X_DIM].astype(jnp.bfloat16),                         # (2E, H)
        "w1b": w1[X_DIM:],                                              # (2, H) f32
        "w_hidden": jnp.stack(ws[1:N_LAYERS - 1]).astype(jnp.bfloat16),  # (8, H, H)
        "w10": w10_pad.astype(jnp.bfloat16),                            # (H, OUT_PAD)
        "biases": b_stack,                                              # (10, H) f32
    }


def reference_forward_f32(x, z, ws, bs):
    """Pure-f32 reference mirroring the PyTorch module exactly."""
    h = jnp.concatenate([x, z], axis=1)
    for i in range(N_LAYERS - 1):
        h = jnp.maximum(h @ ws[i] + bs[i], 0.0)
    return h @ ws[-1] + bs[-1]


def reference_forward_kernel_dtypes(x_bf16, z, p):
    """Pure-JAX reference mirroring the kernel's bf16/f32 dtype strategy."""
    h = jnp.dot(x_bf16, p["w1a"], preferred_element_type=jnp.float32)
    w1b = p["w1b"]
    h = h + z[:, 0:1] * w1b[0:1, :] + z[:, 1:2] * w1b[1:2, :]
    h = jnp.maximum(h + p["biases"][0:1, :], 0.0)
    for i in range(N_HIDDEN_MM):
        h = jnp.dot(h.astype(jnp.bfloat16), p["w_hidden"][i],
                    preferred_element_type=jnp.float32)
        h = jnp.maximum(h + p["biases"][i + 1:i + 2, :], 0.0)
    out = jnp.dot(h.astype(jnp.bfloat16), p["w10"],
                  preferred_element_type=jnp.float32)
    out = out + p["biases"][N_LAYERS - 1:N_LAYERS, :OUT_PAD]
    return out[:, :OUT_DIM]


if __name__ == "__main__":
    key = jax.random.PRNGKey(0)
    key, kx, kz = jax.random.split(key, 3)
    batch = 200                    # exercises batch padding + a 2-step grid
    x = jax.random.normal(kx, (batch, X_DIM), jnp.float32)
    zandmass = jax.random.normal(kz, (batch, Z_DIM), jnp.float32)

    ws, bs = init_params(key)
    params = pack_params(ws, bs)

    out = ccs_predictor_pallas(x, zandmass, params)
    out = jax.block_until_ready(out)
    assert out.shape == (batch, OUT_DIM)

    # Tight check against a JAX reference that uses the same bf16 strategy.
    ref_same = reference_forward_kernel_dtypes(x.astype(jnp.bfloat16), zandmass, params)
    assert jnp.allclose(out, ref_same, rtol=1e-2, atol=1e-2), \
        "mismatch vs bf16-path JAX reference"

    # Looser check against the exact f32 PyTorch-equivalent forward pass
    # (bf16 weights/activations over 9 chained layers -> percent-level drift).
    ref_f32 = reference_forward_f32(x, zandmass, ws, bs)
    assert jnp.allclose(out, ref_f32, rtol=5e-2, atol=2.5e-2), \
        "mismatch vs f32 PyTorch-equivalent reference"

    print("KERNEL_OK")
</pallas_src>

<mosaic_0001>
module attributes {stable_mosaic.version = 11 : i64} {
  func.func @_probe_kernel(%arg0: i32, %arg1: memref<8x128xf32, #tpu.memory_space<vmem>>, %arg2: memref<8x128xf32, #tpu.memory_space<vmem>>) attributes {dimension_semantics = [#tpu.dimension_semantics<arbitrary>], iteration_bounds = array<i64: 2>, scalar_prefetch = 0 : i64, scratch_operands = 0 : i64, tpu.core_type = #tpu.core_type<tc>, window_params = [{pipeline_mode = #tpu.pipeline_mode<synchronous>, transform_indices = @transform_0, window_bounds = array<i64: 8, 128>}, {pipeline_mode = #tpu.pipeline_mode<synchronous>, transform_indices = @transform_1, window_bounds = array<i64: 8, 128>}]} {
    %c0 = arith.constant 0 : index
    %c0_0 = arith.constant 0 : index
    %0 = vector.load %arg1[%c0, %c0_0] : memref<8x128xf32, #tpu.memory_space<vmem>>, vector<8x128xf32>
    %cst = arith.constant 2.000000e+00 : f32
    %1 = vector.broadcast %cst : f32 to vector<8x128xf32>
    %2 = arith.mulf %0, %1 : vector<8x128xf32>
    %c0_1 = arith.constant 0 : index
    %c0_2 = arith.constant 0 : index
    %3 = vector.load %arg2[%c0_1, %c0_2] : memref<8x128xf32, #tpu.memory_space<vmem>>, vector<8x128xf32>
    tpu.vector_store %arg2[%c0_1, %c0_2], %2 {strides = array<i32>} : memref<8x128xf32, #tpu.memory_space<vmem>>, vector<8x128xf32>,
    return
  }
  func.func @transform_0(%arg0: i32) -> (i32, i32) {
    %c0_i32 = arith.constant 0 : i32
    %c0_i32_0 = arith.constant 0 : i32
    %c0_i32_1 = arith.constant 0 : i32
    return %c0_i32, %c0_i32_0 : i32, i32
  }
  func.func @transform_1(%arg0: i32) -> (i32, i32) {
    %c0_i32 = arith.constant 0 : i32
    %c0_i32_0 = arith.constant 0 : i32
    %c0_i32_1 = arith.constant 0 : i32
    return %c0_i32, %c0_i32_0 : i32, i32
  }
}

module attributes {stable_mosaic.version = 11 : i64} {
  func.func @_mlp_kernel(%arg0: i32, %arg1: memref<112x128xbf16, #tpu.memory_space<vmem>>, %arg2: memref<112x2xf32, #tpu.memory_space<vmem>>, %arg3: memref<128x128xbf16, #tpu.memory_space<vmem>>, %arg4: memref<2x128xf32, #tpu.memory_space<vmem>>, %arg5: memref<8x128x128xbf16, #tpu.memory_space<vmem>>, %arg6: memref<128x128xbf16, #tpu.memory_space<vmem>>, %arg7: memref<10x128xf32, #tpu.memory_space<vmem>>, %arg8: memref<112x128xf32, #tpu.memory_space<vmem>>) attributes {dimension_semantics = [#tpu.dimension_semantics<parallel>], iteration_bounds = array<i64: 2>, scalar_prefetch = 0 : i64, scratch_operands = 0 : i64, tpu.core_type = #tpu.core_type<tc>, window_params = [{transform_indices = @transform_0, window_bounds = array<i64: 112, 128>}, {transform_indices = @transform_1, window_bounds = array<i64: 112, 2>}, {pipeline_mode = #tpu.pipeline_mode<synchronous>, transform_indices = @transform_2, window_bounds = array<i64: 128, 128>}, {pipeline_mode = #tpu.pipeline_mode<synchronous>, transform_indices = @transform_3, window_bounds = array<i64: 2, 128>}, {pipeline_mode = #tpu.pipeline_mode<synchronous>, transform_indices = @transform_4, window_bounds = array<i64: 8, 128, 128>}, {pipeline_mode = #tpu.pipeline_mode<synchronous>, transform_indices = @transform_5, window_bounds = array<i64: 128, 128>}, {pipeline_mode = #tpu.pipeline_mode<synchronous>, transform_indices = @transform_6, window_bounds = array<i64: 10, 128>}, {transform_indices = @transform_7, window_bounds = array<i64: 112, 128>}]} {
    %c0 = arith.constant 0 : index
    %c0_0 = arith.constant 0 : index
    %0 = vector.load %arg2[%c0, %c0_0] : memref<112x2xf32, #tpu.memory_space<vmem>>, vector<112x2xf32>
    %c0_1 = arith.constant 0 : index
    %c0_2 = arith.constant 0 : index
    %1 = vector.load %arg1[%c0_1, %c0_2] : memref<112x128xbf16, #tpu.memory_space<vmem>>, vector<112x128xbf16>
    %c0_3 = arith.constant 0 : index
    %c0_4 = arith.constant 0 : index
    %2 = vector.load %arg3[%c0_3, %c0_4] : memref<128x128xbf16, #tpu.memory_space<vmem>>, vector<128x128xbf16>
    %cst = arith.constant dense<0.000000e+00> : vector<112x128xf32>
    %3 = tpu.matmul %1, %2, %cst {dimension_numbers = #tpu.dot_dimension_numbers<[1], [0], [0], [1], [0, 0, 1, 1], [], []>} : vector<112x128xbf16>, vector<128x128xbf16>, vector<112x128xf32> -> vector<112x128xf32>
    %c0_5 = arith.constant 0 : index
    %c0_6 = arith.constant 0 : index
    %4 = vector.load %arg4[%c0_5, %c0_6] : memref<2x128xf32, #tpu.memory_space<vmem>>, vector<2x128xf32>
    %5 = vector.extract_strided_slice %0 {offsets = [0, 0], sizes = [112, 1], strides = [1, 1]} : vector<112x2xf32> to vector<112x1xf32>
    %6 = vector.extract_strided_slice %4 {offsets = [0, 0], sizes = [1, 128], strides = [1, 1]} : vector<2x128xf32> to vector<1x128xf32>
    %7 = vector.broadcast %5 : vector<112x1xf32> to vector<112x128xf32>
    %8 = vector.broadcast %6 : vector<1x128xf32> to vector<112x128xf32>
    %9 = arith.mulf %7, %8 : vector<112x128xf32>
    %10 = arith.addf %3, %9 : vector<112x128xf32>
    %11 = vector.extract_strided_slice %0 {offsets = [0, 1], sizes = [112, 1], strides = [1, 1]} : vector<112x2xf32> to vector<112x1xf32>
    %12 = vector.extract_strided_slice %4 {offsets = [1, 0], sizes = [1, 128], strides = [1, 1]} : vector<2x128xf32> to vector<1x128xf32>
    %13 = vector.broadcast %11 : vector<112x1xf32> to vector<112x128xf32>
    %14 = vector.broadcast %12 : vector<1x128xf32> to vector<112x128xf32>
    %15 = arith.mulf %13, %14 : vector<112x128xf32>
    %16 = arith.addf %10, %15 : vector<112x128xf32>
    %c0_7 = arith.constant 0 : index
    %c0_8 = arith.constant 0 : index
    %17 = vector.load %arg7[%c0_7, %c0_8] : memref<10x128xf32, #tpu.memory_space<vmem>>, vector<1x128xf32>
    %18 = vector.broadcast %17 : vector<1x128xf32> to vector<112x128xf32>
    %19 = arith.addf %16, %18 : vector<112x128xf32>
    %cst_9 = arith.constant 0.000000e+00 : f32
    %20 = vector.broadcast %cst_9 : f32 to vector<112x128xf32>
    %21 = arith.maximumf %19, %20 : vector<112x128xf32>
    %22 = arith.truncf %21 : vector<112x128xf32> to vector<112x128xbf16>
    %c0_10 = arith.constant 0 : index
    %c0_11 = arith.constant 0 : index
    %c0_12 = arith.constant 0 : index
    %23 = vector.load %arg5[%c0_10, %c0_11, %c0_12] : memref<8x128x128xbf16, #tpu.memory_space<vmem>>, vector<1x128x128xbf16>
    %24 = vector.shape_cast %23 : vector<1x128x128xbf16> to vector<128x128xbf16>
    %cst_13 = arith.constant dense<0.000000e+00> : vector<112x128xf32>
    %25 = tpu.matmul %22, %24, %cst_13 {dimension_numbers = #tpu.dot_dimension_numbers<[1], [0], [0], [1], [0, 0, 1, 1], [], []>} : vector<112x128xbf16>, vector<128x128xbf16>, vector<112x128xf32> -> vector<112x128xf32>
    %c1 = arith.constant 1 : index
    %c0_14 = arith.constant 0 : index
    %26 = vector.load %arg7[%c1, %c0_14] : memref<10x128xf32, #tpu.memory_space<vmem>>, vector<1x128xf32>
    %27 = vector.broadcast %26 : vector<1x128xf32> to vector<112x128xf32>
    %28 = arith.addf %25, %27 : vector<112x128xf32>
    %cst_15 = arith.constant 0.000000e+00 : f32
    %29 = vector.broadcast %cst_15 : f32 to vector<112x128xf32>
    %30 = arith.maximumf %28, %29 : vector<112x128xf32>
    %31 = arith.truncf %30 : vector<112x128xf32> to vector<112x128xbf16>
    %c1_16 = arith.constant 1 : index
    %c0_17 = arith.constant 0 : index
    %c0_18 = arith.constant 0 : index
    %32 = vector.load %arg5[%c1_16, %c0_17, %c0_18] : memref<8x128x128xbf16, #tpu.memory_space<vmem>>, vector<1x128x128xbf16>
    %33 = vector.shape_cast %32 : vector<1x128x128xbf16> to vector<128x128xbf16>
    %cst_19 = arith.constant dense<0.000000e+00> : vector<112x128xf32>
    %34 = tpu.matmul %31, %33, %cst_19 {dimension_numbers = #tpu.dot_dimension_numbers<[1], [0], [0], [1], [0, 0, 1, 1], [], []>} : vector<112x128xbf16>, vector<128x128xbf16>, vector<112x128xf32> -> vector<112x128xf32>
    %c2 = arith.constant 2 : index
    %c0_20 = arith.constant 0 : index
    %35 = vector.load %arg7[%c2, %c0_20] : memref<10x128xf32, #tpu.memory_space<vmem>>, vector<1x128xf32>
    %36 = vector.broadcast %35 : vector<1x128xf32> to vector<112x128xf32>
    %37 = arith.addf %34, %36 : vector<112x128xf32>
    %cst_21 = arith.constant 0.000000e+00 : f32
    %38 = vector.broadcast %cst_21 : f32 to vector<112x128xf32>
    %39 = arith.maximumf %37, %38 : vector<112x128xf32>
    %40 = arith.truncf %39 : vector<112x128xf32> to vector<112x128xbf16>
    %c2_22 = arith.constant 2 : index
    %c0_23 = arith.constant 0 : index
    %c0_24 = arith.constant 0 : index
    %41 = vector.load %arg5[%c2_22, %c0_23, %c0_24] : memref<8x128x128xbf16, #tpu.memory_space<vmem>>, vector<1x128x128xbf16>
    %42 = vector.shape_cast %41 : vector<1x128x128xbf16> to vector<128x128xbf16>
    %cst_25 = arith.constant dense<0.000000e+00> : vector<112x128xf32>
    %43 = tpu.matmul %40, %42, %cst_25 {dimension_numbers = #tpu.dot_dimension_numbers<[1], [0], [0], [1], [0, 0, 1, 1], [], []>} : vector<112x128xbf16>, vector<128x128xbf16>, vector<112x128xf32> -> vector<112x128xf32>
    %c3 = arith.constant 3 : index
    %c0_26 = arith.constant 0 : index
    %44 = vector.load %arg7[%c3, %c0_26] : memref<10x128xf32, #tpu.memory_space<vmem>>, vector<1x128xf32>
    %45 = vector.broadcast %44 : vector<1x128xf32> to vector<112x128xf32>
    %46 = arith.addf %43, %45 : vector<112x128xf32>
    %cst_27 = arith.constant 0.000000e+00 : f32
    %47 = vector.broadcast %cst_27 : f32 to vector<112x128xf32>
    %48 = arith.maximumf %46, %47 : vector<112x128xf32>
    %49 = arith.truncf %48 : vector<112x128xf32> to vector<112x128xbf16>
    %c3_28 = arith.constant 3 : index
    %c0_29 = arith.constant 0 : index
    %c0_30 = arith.constant 0 : index
    %50 = vector.load %arg5[%c3_28, %c0_29, %c0_30] : memref<8x128x128xbf16, #tpu.memory_space<vmem>>, vector<1x128x128xbf16>
    %51 = vector.shape_cast %50 : vector<1x128x128xbf16> to vector<128x128xbf16>
    %cst_31 = arith.constant dense<0.000000e+00> : vector<112x128xf32>
    %52 = tpu.matmul %49, %51, %cst_31 {dimension_numbers = #tpu.dot_dimension_numbers<[1], [0], [0], [1], [0, 0, 1, 1], [], []>} : vector<112x128xbf16>, vector<128x128xbf16>, vector<112x128xf32> -> vector<112x128xf32>
    %c4 = arith.constant 4 : index
    %c0_32 = arith.constant 0 : index
    %53 = vector.load %arg7[%c4, %c0_32] : memref<10x128xf32, #tpu.memory_space<vmem>>, vector<1x128xf32>
    %54 = vector.broadcast %53 : vector<1x128xf32> to vector<112x128xf32>
    %55 = arith.addf %52, %54 : vector<112x128xf32>
    %cst_33 = arith.constant 0.000000e+00 : f32
    %56 = vector.broadcast %cst_33 : f32 to vector<112x128xf32>
    %57 = arith.maximumf %55, %56 : vector<112x128xf32>
    %58 = arith.truncf %57 : vector<112x128xf32> to vector<112x128xbf16>
    %c4_34 = arith.constant 4 : index
    %c0_35 = arith.constant 0 : index
    %c0_36 = arith.constant 0 : index
    %59 = vector.load %arg5[%c4_34, %c0_35, %c0_36] : memref<8x128x128xbf16, #tpu.memory_space<vmem>>, vector<1x128x128xbf16>
    %60 = vector.shape_cast %59 : vector<1x128x128xbf16> to vector<128x128xbf16>
    %cst_37 = arith.constant dense<0.000000e+00> : vector<112x128xf32>
    %61 = tpu.matmul %58, %60, %cst_37 {dimension_numbers = #tpu.dot_dimension_numbers<[1], [0], [0], [1], [0, 0, 1, 1], [], []>} : vector<112x128xbf16>, vector<128x128xbf16>, vector<112x128xf32> -> vector<112x128xf32>
    %c5 = arith.constant 5 : index
    %c0_38 = arith.constant 0 : index
    %62 = vector.load %arg7[%c5, %c0_38] : memref<10x128xf32, #tpu.memory_space<vmem>>, vector<1x128xf32>
    %63 = vector.broadcast %62 : vector<1x128xf32> to vector<112x128xf32>
    %64 = arith.addf %61, %63 : vector<112x128xf32>
    %cst_39 = arith.constant 0.000000e+00 : f32
    %65 = vector.broadcast %cst_39 : f32 to vector<112x128xf32>
    %66 = arith.maximumf %64, %65 : vector<112x128xf32>
    %67 = arith.truncf %66 : vector<112x128xf32> to vector<112x128xbf16>
    %c5_40 = arith.constant 5 : index
    %c0_41 = arith.constant 0 : index
    %c0_42 = arith.constant 0 : index
    %68 = vector.load %arg5[%c5_40, %c0_41, %c0_42] : memref<8x128x128xbf16, #tpu.memory_space<vmem>>, vector<1x128x128xbf16>
    %69 = vector.shape_cast %68 : vector<1x128x128xbf16> to vector<128x128xbf16>
    %cst_43 = arith.constant dense<0.000000e+00> : vector<112x128xf32>
    %70 = tpu.matmul %67, %69, %cst_43 {dimension_numbers = #tpu.dot_dimension_numbers<[1], [0], [0], [1], [0, 0, 1, 1], [], []>} : vector<112x128xbf16>, vector<128x128xbf16>, vector<112x128xf32> -> vector<112x128xf32>
    %c6 = arith.constant 6 : index
    %c0_44 = arith.constant 0 : index
    %71 = vector.load %arg7[%c6, %c0_44] : memref<10x128xf32, #tpu.memory_space<vmem>>, vector<1x128xf32>
    %72 = vector.broadcast %71 : vector<1x128xf32> to vector<112x128xf32>
    %73 = arith.addf %70, %72 : vector<112x128xf32>
    %cst_45 = arith.constant 0.000000e+00 : f32
    %74 = vector.broadcast %cst_45 : f32 to vector<112x128xf32>
    %75 = arith.maximumf %73, %74 : vector<112x128xf32>
    %76 = arith.truncf %75 : vector<112x128xf32> to vector<112x128xbf16>
    %c6_46 = arith.constant 6 : index
    %c0_47 = arith.constant 0 : index
    %c0_48 = arith.constant 0 : index
    %77 = vector.load %arg5[%c6_46, %c0_47, %c0_48] : memref<8x128x128xbf16, #tpu.memory_space<vmem>>, vector<1x128x128xbf16>
    %78 = vector.shape_cast %77 : vector<1x128x128xbf16> to vector<128x128xbf16>
    %cst_49 = arith.constant dense<0.000000e+00> : vector<112x128xf32>
    %79 = tpu.matmul %76, %78, %cst_49 {dimension_numbers = #tpu.dot_dimension_numbers<[1], [0], [0], [1], [0, 0, 1, 1], [], []>} : vector<112x128xbf16>, vector<128x128xbf16>, vector<112x128xf32> -> vector<112x128xf32>
    %c7 = arith.constant 7 : index
    %c0_50 = arith.constant 0 : index
    %80 = vector.load %arg7[%c7, %c0_50] : memref<10x128xf32, #tpu.memory_space<vmem>>, vector<1x128xf32>
    %81 = vector.broadcast %80 : vector<1x128xf32> to vector<112x128xf32>
    %82 = arith.addf %79, %81 : vector<112x128xf32>
    %cst_51 = arith.constant 0.000000e+00 : f32
    %83 = vector.broadcast %cst_51 : f32 to vector<112x128xf32>
    %84 = arith.maximumf %82, %83 : vector<112x128xf32>
    %85 = arith.truncf %84 : vector<112x128xf32> to vector<112x128xbf16>
    %c7_52 = arith.constant 7 : index
    %c0_53 = arith.constant 0 : index
    %c0_54 = arith.constant 0 : index
    %86 = vector.load %arg5[%c7_52, %c0_53, %c0_54] : memref<8x128x128xbf16, #tpu.memory_space<vmem>>, vector<1x128x128xbf16>
    %87 = vector.shape_cast %86 : vector<1x128x128xbf16> to vector<128x128xbf16>
    %cst_55 = arith.constant dense<0.000000e+00> : vector<112x128xf32>
    %88 = tpu.matmul %85, %87, %cst_55 {dimension_numbers = #tpu.dot_dimension_numbers<[1], [0], [0], [1], [0, 0, 1, 1], [], []>} : vector<112x128xbf16>, vector<128x128xbf16>, vector<112x128xf32> -> vector<112x128xf32>
    %c8 = arith.constant 8 : index
    %c0_56 = arith.constant 0 : index
    %89 = vector.load %arg7[%c8, %c0_56] : memref<10x128xf32, #tpu.memory_space<vmem>>, vector<1x128xf32>
    %90 = vector.broadcast %89 : vector<1x128xf32> to vector<112x128xf32>
    %91 = arith.addf %88, %90 : vector<112x128xf32>
    %cst_57 = arith.constant 0.000000e+00 : f32
    %92 = vector.broadcast %cst_57 : f32 to vector<112x128xf32>
    %93 = arith.maximumf %91, %92 : vector<112x128xf32>
    %94 = arith.truncf %93 : vector<112x128xf32> to vector<112x128xbf16>
    %c0_58 = arith.constant 0 : index
    %c0_59 = arith.constant 0 : index
    %95 = vector.load %arg6[%c0_58, %c0_59] : memref<128x128xbf16, #tpu.memory_space<vmem>>, vector<128x128xbf16>
    %cst_60 = arith.constant dense<0.000000e+00> : vector<112x128xf32>
    %96 = tpu.matmul %94, %95, %cst_60 {dimension_numbers = #tpu.dot_dimension_numbers<[1], [0], [0], [1], [0, 0, 1, 1], [], []>} : vector<112x128xbf16>, vector<128x128xbf16>, vector<112x128xf32> -> vector<112x128xf32>
    %c9 = arith.constant 9 : index
    %c0_61 = arith.constant 0 : index
    %97 = vector.load %arg7[%c9, %c0_61] : memref<10x128xf32, #tpu.memory_space<vmem>>, vector<1x128xf32>
    %98 = vector.broadcast %97 : vector<1x128xf32> to vector<112x128xf32>
    %99 = arith.addf %96, %98 : vector<112x128xf32>
    %c0_62 = arith.constant 0 : index
    %c0_63 = arith.constant 0 : index
    %100 = vector.load %arg8[%c0_62, %c0_63] : memref<112x128xf32, #tpu.memory_space<vmem>>, vector<112x128xf32>
    tpu.vector_store %arg8[%c0_62, %c0_63], %99 {strides = array<i32>} : memref<112x128xf32, #tpu.memory_space<vmem>>, vector<112x128xf32>,
    return
  }
  func.func @transform_0(%arg0: i32) -> (i32, i32) {
    %c0_i32 = arith.constant 0 : i32
    %c0_i32_0 = arith.constant 0 : i32
    return %arg0, %c0_i32 : i32, i32
  }
  func.func @transform_1(%arg0: i32) -> (i32, i32) {
    %c0_i32 = arith.constant 0 : i32
    %c0_i32_0 = arith.constant 0 : i32
    return %arg0, %c0_i32 : i32, i32
  }
  func.func @transform_2(%arg0: i32) -> (i32, i32) {
    %c0_i32 = arith.constant 0 : i32
    %c0_i32_0 = arith.constant 0 : i32
    %c0_i32_1 = arith.constant 0 : i32
    return %c0_i32, %c0_i32_0 : i32, i32
  }
  func.func @transform_3(%arg0: i32) -> (i32, i32) {
    %c0_i32 = arith.constant 0 : i32
    %c0_i32_0 = arith.constant 0 : i32
    %c0_i32_1 = arith.constant 0 : i32
    return %c0_i32, %c0_i32_0 : i32, i32
  }
  func.func @transform_4(%arg0: i32) -> (i32, i32, i32) {
    %c0_i32 = arith.constant 0 : i32
    %c0_i32_0 = arith.constant 0 : i32
    %c0_i32_1 = arith.constant 0 : i32
    %c0_i32_2 = arith.constant 0 : i32
    return %c0_i32, %c0_i32_0, %c0_i32_1 : i32, i32, i32
  }
  func.func @transform_5(%arg0: i32) -> (i32, i32) {
    %c0_i32 = arith.constant 0 : i32
    %c0_i32_0 = arith.constant 0 : i32
    %c0_i32_1 = arith.constant 0 : i32
    return %c0_i32, %c0_i32_0 : i32, i32
  }
  func.func @transform_6(%arg0: i32) -> (i32, i32) {
    %c0_i32 = arith.constant 0 : i32
    %c0_i32_0 = arith.constant 0 : i32
    %c0_i32_1 = arith.constant 0 : i32
    return %c0_i32, %c0_i32_0 : i32, i32
  }
  func.func @transform_7(%arg0: i32) -> (i32, i32) {
    %c0_i32 = arith.constant 0 : i32
    %c0_i32_0 = arith.constant 0 : i32
    return %arg0, %c0_i32 : i32, i32
  }
}

</mosaic_0001>

<bundles_post_ra>
// kernel: tpu_custom_call.1
= control target key start
LH: loop header
LB: loop body
LE: loop exit
PB: predicated region body
PF: predicated region fallthrough
CT: control target
= control target key end

     0   :  { %6 = vsyncpa [#allocation3], 0  ;;  %s287_s0 = inlined_call_operand.hbm [shape: f32[8,128], index: 0, kind: input, shape index: {}]   ;;  %s288_s1 = inlined_call_operand.hbm [shape: f32[8,128], index: 1, kind: output, shape index: {}]  }
   0x1   :  { %7 = vsyncpa [#allocation4], 0  ;;  %s270_s6 = smov 0  }
   0x2 LB: > { %s149_s7 = sadd.s32 4294967295, %s256_s6   ;;  %p150_p0 = scmp.ge.s32.totalorder %s256_s6, 1  ;;  %s256_s6 = sphi %s270_s6, %s13_s6  }
   0x3   : > { %p60_p1 = scmp.lt.s32.totalorder %s256_s6, 3  ;;  %s72_s10 = sshll.u32 %s287_s0, 4  ;;  %s73_s10 = int_to_ptr.hbm [resolvable:$true] %s72_s10 }
   0x4   : > { %p170_p3 = scmp.eq.s32.totalorder %s149_s7, 0  ;;  %s258_s11 = smov [#allocation2]  }
   0x5   : > { %p61_p2 = pnand %p150_p0, %p60_p1  ;;  %s74_s12 = sshll.u32 %s258_s11, 4  ;;  %s75_s12 = int_to_ptr.vmem [resolvable:$true] %s74_s12 }
   0x7   : > { %p166_p4 = pneg %p61_p2  ;;  %87 = sbr.rel (%p61_p2) target bundleno = 20 (0x14), region = 24 }
   0x9   : > { %p167_p5 = pnand %p170_p3, %p166_p4 }
   0xb   : > { %169 = dma.hbm_to_vmem [thread:$0]  (!%p167_p5), %s73_s10, 128, %s75_s12, [#allocation3]  }
   0xc   : > { %247 = dma.done.wait (%p170_p3), [#allocation3], 128  }
   0xd   : > { %249 = vsyncadd (%p170_p3), [#allocation3], 4294967168  ;;  %s259_s13 = smov [#allocation5]   ;;  %s109_s17 = sshll.u32 %s288_s1, 4  ;;  %v98_v0 = vld [vmem:[#allocation2] sm:$0xff]  ;;  %s110_s17 = int_to_ptr.hbm [resolvable:$true] %s109_s17 }
   0xe   : > { %s107_s14 = sshll.u32 %s259_s13, 4  ;;  %p172_p6 = scmp.eq.s32.totalorder %s149_s7, 1  ;;  %v99_v1 = vmul.f32 2.0, %v98_v0  ;;  %s108_s14 = int_to_ptr.vmem [resolvable:$true] %s107_s14 }
  0x10   : > { %100 = vst [vmem:[#allocation5] sm:$0xff] %v99_v1 }
  0x11   : > { %163 = dma.vmem_to_hbm [thread:$0]  (%p172_p6), %s108_s14, 128, %s110_s17, [#allocation4]  }
  0x12   : > { %251 = dma.done.wait (%p172_p6), [#allocation4], 128  }
  0x13   : > { %253 = vsyncadd (%p172_p6), [#allocation4], 4294967168 }
  0x14 PF: > { %s13_s6 = sadd.s32 1, %s256_s6  }
  0x15   : > { %p10_p7 = scmp.ge.s32.totalorder %s13_s6, 4  }
  0x17   :  { %12 = sbr.rel (!%p10_p7) target bundleno = 2 (0x2), region = 53 }
  0x1c   :  { %123 = vsyncpa [#allocation3], 1 }
  0x1d   :  { %125 = vsyncpa [#allocation3 + $0x1], 1 }
  0x1e   :  { %126 = vsyncpa [#allocation4], 1 }
  0x1f   :  { %128 = vsyncpa [#allocation4 + $0x1], 1 }

// kernel: tpu_custom_call.1
= control target key start
LH: loop header
LB: loop body
LE: loop exit
PB: predicated region body
PF: predicated region fallthrough
CT: control target
= control target key end

     0   :  { %12 = vsyncpa [#allocation3], 0  ;;  %s3160_s0 = inlined_call_operand.vmem [shape: bf16[224,128], index: 0, kind: input, shape index: {}]   ;;  %s3161_s1 = inlined_call_operand.vmem [shape: f32[224,2], index: 1, kind: input, shape index: {}]   ;;  %s3162_s2 = inlined_call_operand.vmem [shape: bf16[128,128], index: 2, kind: input, shape index: {}]   ;;  %s3163_s3 = inlined_call_operand.vmem [shape: f32[2,128], index: 3, kind: input, shape index: {}]   ;;  %s3164_s4 = inlined_call_operand.hbm [shape: bf16[8,128,128], index: 4, kind: input, shape index: {}]   ;;  %s3165_s5 = inlined_call_operand.hbm [shape: bf16[128,128], index: 5, kind: input, shape index: {}]   ;;  %s3166_s6 = inlined_call_operand.vmem [shape: f32[10,128], index: 6, kind: input, shape index: {}]   ;;  %s3167_s7 = inlined_call_operand.hbm [shape: f32[224,128], index: 7, kind: output, shape index: {}]  }
   0x1   :  { %13 = vsyncpa [#allocation6], 0 }
   0x2   :  { %14 = vsyncpa [#allocation4], 0 }
   0x3   :  { %16 = vsyncpa [#allocation4 + $0x1], 0  ;;  %s2751_s24 = smov 0   ;;  %s2753_s25 = smov 0  }
   0x4   :  { %s2755_s26 = smov 0   ;;  %s2757_s27 = smov 0  }
   0x5 LB: > { %s2772_s28 = sadd.s32 4294967295, %s2701_s27   ;;  %s2013_s29 = sadd.s32 4294967294, %s2701_s27   ;;  %s2701_s27 = sphi %s2757_s27, %s3174_s27   ;;  %s2697_s26 = sphi %s2755_s26, %s3173_s26   ;;  %s2693_s25 = sphi %s2753_s25, %s3172_s25   ;;  %s2689_s24 = sphi %s2751_s24, %s3171_s24  }
   0x6   : > { %s2776_s30 = sadd.s32 1, %s2701_s27   ;;  %s186_s8 = sadd.s32 1, %s2697_s26 }
   0x7   : > { %s183_s9 = ssub.s32 %s2701_s27, %s2776_s30  ;;  %p196_p0 = scmp.ne.s32.totalorder %s2697_s26, %s2693_s25 }
   0x8   : > { %p184_p1 = scmp.eq.s32.totalorder %s183_s9, 0  ;;  %p197_p2 = scmp.eq.s32.totalorder %s2772_s28, 1 }
   0x9   : > { %p202_p3 = scmp.ne.s32.totalorder %s2693_s25, %s2689_s24  ;;  %p203_p4 = scmp.eq.s32.totalorder %s2013_s29, 1 }
   0xa   : > { %s2787_s10 = scalar_select %p184_p1, %s2697_s26, %s186_s8  }
   0xb   : > { %p2789_p5 = por %p197_p2, %p196_p0  ;;  %p2793_p6 = por %p203_p4, %p202_p3 }
   0xc   : > { %p2014_p7 = scmp.ge.s32.totalorder %s2701_s27, 1  ;;  %p210_p8 = scmp.lt.s32.totalorder %s2701_s27, 3 }
   0xd   : > { %p2500_p9 = scmp.eq.s32.totalorder %s2772_s28, 0  ;;  %s227_s16 = sshll.u32 %s3164_s4, 4  ;;  %s228_s16 = int_to_ptr.hbm [resolvable:$true] %s227_s16 }
   0xe   : > { %p2800_p10 = pnand %p2014_p7, %p210_p8  ;;  %s2703_s17 = smov [#allocation2]  }
   0xf   : > { %s229_s18 = sshll.u32 %s2703_s17, 4  ;;  %s241_s21 = sshll.u32 %s3165_s5, 4  ;;  %s230_s18 = int_to_ptr.vmem [resolvable:$true] %s229_s18  ;;  %s242_s21 = int_to_ptr.hbm [resolvable:$true] %s241_s21 }
  0x10   : > { %p2489_p11 = pneg %p2800_p10  ;;  %s2704_s22 = smov 64  }
  0x11   : > { %s2705_s23 = smov 4   ;;  %s2706_s29 = smov [#allocation5]  }
  0x12   : > { %p2490_p12 = pnand %p2500_p9, %p2489_p11  ;;  %s243_s8 = sshll.u32 %s2706_s29, 4  ;;  %s244_s8 = int_to_ptr.vmem [resolvable:$true] %s243_s8 }
  0x13   : > { %280 = sbr.rel (%p2800_p10) target bundleno = 1585 (0x631), region = 48 }
  0x14   : > { %2492 = dma.hbm_to_vmem [thread:$0]  (!%p2490_p12), %s228_s16, 8192, %s230_s18, [#allocation3], %s2704_s22, %s2704_s22, %s2705_s23  }
  0x15   : > { %2495 = dma.hbm_to_vmem [thread:$0]  (!%p2490_p12), %s242_s21, 1024, %s244_s8, [#allocation6], %s2704_s22, %s2704_s22, %s2705_s23  }
  0x18   : > { %2676 = dma.done.wait (%p2500_p9), [#allocation3], 8192  }
  0x19   : > { %2678 = vsyncadd (%p2500_p9), [#allocation3], 4294959104 }
  0x1a   : > { %2680 = dma.done.wait (%p2500_p9), [#allocation6], 1024  }
  0x1b   : > { %2682 = vsyncadd (%p2500_p9), [#allocation6], 4294966272  ;;  %s323_s9 = smul.u32 14, %s2772_s28  ;;  %v2707_v0 = vmov 1   ;;  %v2708_v1 = vmov 0   ;;  %v2388_v2 = vld [vmem:[%s3162_s2 + $0x38] sm:$0xff] }
  0x1c   : > { %2546 = vset.pattern.permute.xlu1 %v2707_v0  ;;  %2545 = vset.pattern.permute.xlu0 %v2708_v1  ;;  %v2387_v3 = vld [vmem:[%s3162_s2 + $0x30] sm:$0xff]  ;;  %v2386_v5 = vld [vmem:[%s3162_s2 + $0x28] sm:$0xff]  ;;  %v2385_v7 = vld [vmem:[%s3162_s2 + $0x20] sm:$0xff]  ;;  %s320_s16 = sand.u32 1, %s2693_s25   ;;  %s2461_s22 = smul.u32 112, %s2772_s28 }
  0x1d   : > { %p324_p13 = scmp.lt.s32.totalorder %s323_s9, 27  ;;  %2547 = vset.pattern.permute.xlu2 %v2708_v1  ;;  %556 = vmatpush.bf16.msra.mxu0 %v2388_v2  ;;  %v2384_v8 = vld [vmem:[%s3162_s2 + $0x18] sm:$0xff]  ;;  %v2383_v11 = vld [vmem:[%s3162_s2 + $0x10] sm:$0xff]  ;;  %v2382_v12 = vld [vmem:[%s3162_s2 + $0x8] sm:$0xff]  ;;  %s2478_s17 = smul.u32 112, %s320_s16 }
  0x1e   : > { %2462 = vmatpush.bf16.msra.mxu2 %v2388_v2  ;;  %v2381_v14 = vld [vmem:[%s3162_s2] sm:$0xff]  ;;  %v2396_v31 = vld [vmem:[#allocation2 + $0x38] sm:$0xff]  ;;  %v2395_v32 = vld [vmem:[#allocation2 + $0x30] sm:$0xff] }
  0x1f   : > { %s3176_s9 = smov (!%p324_p13, %s323_s9), 27  ;;  %788 = vmatpush.bf16.msra.mxu1 %v2396_v31  ;;  %2470 = vmatpush.bf16.msra.mxu3 %v2396_v31  ;;  %v2394_v33 = vld [vmem:[#allocation2 + $0x28] sm:$0xff]  ;;  %v2393_v37 = vld [vmem:[#allocation2 + $0x20] sm:$0xff]  ;;  %v2392_v40 = vld [vmem:[#allocation2 + $0x18] sm:$0xff]  ;;  %s3110_s21 = scalar_lea.vmem [#allocation7], %s2478_s17 }
  0x20   : > { %s2022_s13 = sshll.u32 %s3176_s9, 3  ;;  %s2021_s19 = sshll.u32 %s3176_s9, 2  ;;  %v2391_v42 = vld [vmem:[#allocation2 + $0x10] sm:$0xff]  ;;  %v2390_v45 = vld [vmem:[#allocation2 + $0x8] sm:$0xff]  ;;  %v2389_v47 = vld [vmem:[#allocation2] sm:$0xff] }
  0x21   : > { %s2837_s18 = scalar_lea.vmem %s3161_s1, %s2022_s13  ;;  %557 = vmatpush.bf16.msra.mxu0 %v2387_v3  ;;  %s2870_s29 = scalar_lea.vmem %s3160_s0, %s2021_s19  ;;  %v380_v51 = vld [vmem:[%s3163_s3] sm:$0x3] }
  0x22   : > { %v336_v4 = vld [vmem:[%s2837_s18] sm:$0xff]  ;;  %2463 = vmatpush.bf16.msra.mxu2 %v2387_v3  ;;  %v337_v6 = vld [vmem:[%s2837_s18 + $0x8] sm:$0xff]  ;;  %v339_v9 = vld [vmem:[%s2837_s18 + $0x18] sm:$0xff]  ;;  %v2919_v54 = vperm.slane %v380_v51, 0  ;;  %v2921_v55 = vperm.slane %v380_v51, 1  ;;  %s1913_s9 = scalar_lea.hbm %s3167_s7, %s2461_s22  ;;  %s1902_s13 = scalar_lea.sflag [#allocation4], %s320_s16 }
  0x23   : > { %601 = vperm.xlu1 %2546, %v336_v4   ;;  %383 = vperm.xlu0 %2545, %v336_v4   ;;  %v338_v10 = vld [vmem:[%s2837_s18 + $0x10] sm:$0xff]  ;;  %v341_v13 = vld [vmem:[%s2837_s18 + $0x28] sm:$0xff]  ;;  %v2374_v15 = vld [vmem:[%s2870_s29] sm:$0xff]  ;;  %s1916_s8 = sshll.u32 %s1913_s9, 4  ;;  %s2651_s19 = scalar_lea.hbm %s3167_s7, 224  ;;  %s1917_s8 = int_to_ptr.hbm [resolvable:$true] %s1916_s8 }
  0x24   : > { %393 = vperm.xlu2 %2547, %v338_v10   ;;  %v2378_v16 = vld [vmem:[%s2870_s29 + $0x20] sm:$0xff]  ;;  %v342_v17 = vld [vmem:[%s2837_s18 + $0x30] sm:$0xff]  ;;  %v343_v19 = vld [vmem:[%s2837_s18 + $0x38] sm:$0xff]  ;;  %789 = vmatpush.bf16.msra.mxu1 %v2395_v32  ;;  %s2645_s14 = sshra.s32 %s1917_s8, 4  ;;  %s2646_s14 = int_to_ptr.hbm [resolvable:$true] %s2645_s14 }
  0x25   : > { %558 = vmatpush.bf16.msra.mxu0 %v2386_v5  ;;  %v340_v18 = vld [vmem:[%s2837_s18 + $0x20] sm:$0xff]  ;;  %v2375_v20 = vld [vmem:[%s2870_s29 + $0x8] sm:$0xff]  ;;  %v346_v24 = vld [vmem:[%s2837_s18 + $0x50] sm:$0xff]  ;;  %2471 = vmatpush.bf16.msra.mxu3 %v2395_v32  ;;  %s2647_s28 = scalar_lea.hbm %s2646_s14, 112  ;;  %p2652_p3 = scmp.lt.s32.totalorder %s2646_s14, %s3167_s7 }
  0x26   : > { %2464 = vmatpush.bf16.msra.mxu2 %v2386_v5  ;;  %v2379_v21 = vld [vmem:[%s2870_s29 + $0x28] sm:$0xff]  ;;  %v344_v23 = vld [vmem:[%s2837_s18 + $0x40] sm:$0xff]  ;;  %v2376_v25 = vld [vmem:[%s2870_s29 + $0x10] sm:$0xff]  ;;  %p2648_p0 = scmp.ne.s32.totalorder %s2646_s14, %s2647_s28  ;;  %p2653_p4 = scmp.lt.s32.totalorder %s2651_s19, %s2647_s28 }
  0x27   : > { %v345_v22 = vld [vmem:[%s2837_s18 + $0x48] sm:$0xff]  ;;  %v2380_v26 = vld [vmem:[%s2870_s29 + $0x30] sm:$0xff]  ;;  %v347_v28 = vld [vmem:[%s2837_s18 + $0x58] sm:$0xff] }
  0x28   : > { %v349_v27 = vld [vmem:[%s2837_s18 + $0x68] sm:$0xff]  ;;  %v2377_v29 = vld [vmem:[%s2870_s29 + $0x18] sm:$0xff]  ;;  %v348_v30 = vld [vmem:[%s2837_s18 + $0x60] sm:$0xff]  ;;  %790 = vmatpush.bf16.msra.mxu1 %v2394_v33  ;;  %s1914_s18 = sshll.u32 %s3110_s21, 4  ;;  %p2649_p1 = pnand %p2648_p0, %p2789_p5  ;;  %s1915_s18 = int_to_ptr.vmem [resolvable:$true] %s1914_s18 }
  0x29   : > { %559 = vmatpush.bf16.msra.mxu0 %v2385_v7  ;;  %2472 = vmatpush.bf16.msra.mxu3 %v2394_v33  ;;  %v2934_v3 = vld [vmem:[%s3166_s6] ss:$0 sm:$0xff]  ;;  %p2654_p7 = por %p2653_p4, %p2652_p3 }
  0x2a   : > { %2465 = vmatpush.bf16.msra.mxu2 %v2385_v7  ;;  %p2650_p2 = pneg %p2649_p1 }
  0x2b   : > { %605 = vperm.xlu1 %2546, %v337_v6   ;;  %388 = vperm.xlu0 %2545, %v337_v6  }
  0x2c   : > { %398 = vperm.xlu2 %2547, %v339_v9   ;;  %791 = vmatpush.bf16.msra.mxu1 %v2393_v37  ;;  %p2655_p8 = pnand %p2654_p7, %p2650_p2 }
  0x2d   : > { %560 = vmatpush.bf16.msra.mxu0 %v2384_v8  ;;  %2473 = vmatpush.bf16.msra.mxu3 %v2393_v37 }
  0x2e   : > { %2466 = vmatpush.bf16.msra.mxu2 %v2384_v8 }
  0x30   : > { %792 = vmatpush.bf16.msra.mxu1 %v2392_v40 }
  0x31   : > { %561 = vmatpush.bf16.msra.mxu0 %v2383_v11  ;;  %2474 = vmatpush.bf16.msra.mxu3 %v2392_v40 }
  0x32   : > { %2467 = vmatpush.bf16.msra.mxu2 %v2383_v11 }
  0x33   : > { %613 = vperm.xlu1 %2546, %v339_v9   ;;  %2548 = vset.pattern.permute.xlu0 %v2707_v0 }
  0x34   : > { %609 = vperm.xlu0 %2548, %v338_v10   ;;  %403 = vperm.xlu2 %2547, %v340_v18  }
  0x35   : > { %562 = vmatpush.bf16.msra.mxu0 %v2382_v12  ;;  %793 = vmatpush.bf16.msra.mxu1 %v2391_v42 }
  0x36   : > { %2468 = vmatpush.bf16.msra.mxu2 %v2382_v12  ;;  %2475 = vmatpush.bf16.msra.mxu3 %v2391_v42 }
  0x39   : > { %563 = vmatpush.bf16.msra.mxu0 %v2381_v14  ;;  %794 = vmatpush.bf16.msra.mxu1 %v2390_v45 }
  0x3a   : > { %2469 = vmatpush.bf16.msra.mxu2 %v2381_v14  ;;  %2476 = vmatpush.bf16.msra.mxu3 %v2390_v45 }
  0x3b   : > { %2549 = vset.pattern.permute.xlu1 %v2708_v1 }
  0x3c   : > { %408 = vperm.xlu1 %2549, %v341_v13   ;;  %621 = vperm.xlu0 %2548, %v341_v13  }
  0x3d   : > { %564 = vmatmul.bf16.vlgmr.msra.gmra.mxu0 %v2374_v15  ;;  %584 = vmatmul.bf16.vlgmr.msra.gmra.mxu2 %v2378_v16 }
  0x3e   : > { %2550 = vset.pattern.permute.xlu2 %v2707_v0  ;;  %795 = vmatpush.bf16.msra.mxu1 %v2389_v47 }
  0x3f   : > { %617 = vperm.xlu2 %2550, %v340_v18   ;;  %2477 = vmatpush.bf16.msra.mxu3 %v2389_v47 }
  0x44   : > { %413 = vperm.xlu1 %2549, %v342_v17   ;;  %625 = vperm.xlu0 %2548, %v342_v17  }
  0x47   : > { %2551 = vset.pattern.permute.xlu2 %v2708_v1 }
  0x48   : > { %418 = vperm.xlu2 %2551, %v343_v19  }
  0x4c   : > { %2552 = vset.pattern.permute.xlu1 %v2707_v0  ;;  %2553 = vset.pattern.permute.xlu0 %v2708_v1 }
  0x4d   : > { %629 = vperm.xlu1 %2552, %v343_v19   ;;  %569 = vmatmul.bf16.gmra.mxu0 %v2375_v20 }
  0x4e   : > { %589 = vmatmul.bf16.gmra.mxu2 %v2379_v21  ;;  %428 = vperm.xlu0 %2553, %v345_v22  }
  0x50   : > { %423 = vperm.xlu2 %2551, %v344_v23  }
  0x55   : > { %633 = vperm.xlu1 %2552, %v344_v23  }
  0x56   : > { %2557 = vset.pattern.permute.xlu0 %v2707_v0 }
  0x57   : > { %641 = vperm.xlu0 %2557, %v346_v24  }
  0x58   : > { %2554 = vset.pattern.permute.xlu2 %v2707_v0 }
  0x59   : > { %637 = vperm.xlu2 %2554, %v345_v22  }
  0x5d   : > { %2555 = vset.pattern.permute.xlu1 %v2708_v1  ;;  %574 = vmatmul.bf16.gmra.mxu0 %v2376_v25 }
  0x5e   : > { %433 = vperm.xlu1 %2555, %v346_v24   ;;  %594 = vmatmul.bf16.gmra.mxu2 %v2380_v26 }
  0x5f   : > { %653 = vperm.xlu0 %2557, %v349_v27  }
  0x61   : > { %2556 = vset.pattern.permute.xlu2 %v2708_v1 }
  0x62   : > { %438 = vperm.xlu2 %2556, %v347_v28  }
  0x66   : > { %2558 = vset.pattern.permute.xlu1 %v2707_v0 }
  0x67   : > { %645 = vperm.xlu1 %2558, %v347_v28  }
  0x6a   : > { %443 = vperm.xlu2 %2556, %v348_v30  }
  0x6d   : > { %579 = vmatmul.bf16.gmra.mxu0 %v2377_v29 }
  0x6f   : > { %2559 = vset.pattern.permute.xlu1 %v2708_v1 }
  0x70   : > { %448 = vperm.xlu1 %2559, %v349_v27  }
  0x72   : > { %2560 = vset.pattern.permute.xlu2 %v2707_v0 }
  0x73   : > { %649 = vperm.xlu2 %2560, %v348_v30  }
  0x7e   : > { %v394_v35 = vpop.permute.xlu2 %393 }
  0x7f   : > { %v454_v18 = vmul.f32 %v2919_v54, %v394_v35 }
  0x86   : > { %v2900_v39 = vpop.permute.xlu2 %398 }
  0x87   : > { %v455_v35 = vmul.f32 %v2919_v54, %v2900_v39 }
  0x8e   : > { %v2904_v44 = vpop.permute.xlu2 %403 }
  0x95   : > { %v602_v34 = vpop.permute.xlu1 %601  ;;  %v384_v36 = vpop.permute.xlu0 %383 }
  0x96   : > { %v452_v56 = vmul.f32 %v2919_v54, %v384_v36  ;;  %v657_v61 = vmul.f32 %v2921_v55, %v602_v34 }
  0x99   : > { %v2906_v48 = vpop.permute.xlu2 %617 }
  0x9d   : > { %v606_v38 = vpop.permute.xlu1 %605  ;;  %v389_v41 = vpop.permute.xlu0 %388 }
  0x9e   : > { %v453_v1 = vmul.f32 %v2919_v54, %v389_v41  ;;  %v658_v6 = vmul.f32 %v2921_v55, %v606_v38 }
  0xa2   : > { %v2915_v52 = vpop.permute.xlu2 %418 }
  0xa5   : > { %v2902_v43 = vpop.permute.xlu1 %613 }
  0xa6   : > { %v610_v46 = vpop.permute.xlu0 %609  ;;  %v660_v41 = vmul.f32 %v2921_v55, %v2902_v43 }
  0xa7   : > { %v659_v28 = vmul.f32 %v2921_v55, %v610_v46 }
  0xaa   : > { %v424_v59 = vpop.permute.xlu2 %423 }
  0xab   : > { %v460_v63 = vmul.f32 %v2919_v54, %v424_v59 }
  0xae   : > { %v2908_v49 = vpop.permute.xlu1 %408  ;;  %v2910_v50 = vpop.permute.xlu0 %621 }
  0xb3   : > { %v638_v9 = vpop.permute.xlu2 %637 }
  0xb4   : > { %v666_v16 = vmul.f32 %v2921_v55, %v638_v9  ;;  %v661_v9 = vmul.f32 %v2921_v55, %v2906_v48 }
  0xb6   : > { %v2917_v53 = vpop.permute.xlu1 %413  ;;  %v2924_v58 = vpop.permute.xlu0 %625 }
  0xba   : > { %v565_v57 = vpop.f32.mrf.mxu0 }
  0xbb   : > { %v566_v62 = vadd.f32 %v565_v57, %v452_v56 }
  0xbc   : > { %v439_v40 = vpop.permute.xlu2 %438 }
  0xbd   : > { %v671_v2 = vadd.f32 %v657_v61, %v566_v62  ;;  %v463_v56 = vmul.f32 %v2919_v54, %v439_v40  ;;  %v458_v40 = vmul.f32 %v2919_v54, %v2917_v53 }
  0xbf   : > { %v2926_v60 = vpop.permute.xlu1 %629  ;;  %v687_v12 = vadd.f32 %v2934_v3, %v671_v2 }
  0xc0   : > { %v585_v0 = vpop.f32.mrf.mxu2  ;;  %v429_v5 = vpop.permute.xlu0 %428  ;;  %v664_v53 = vmul.f32 %v2921_v55, %v2926_v60 }
  0xc1   : > { %v586_v8 = vadd.f32 %v585_v0, %v460_v63  ;;  %v461_v13 = vmul.f32 %v2919_v54, %v429_v5  ;;  %v701_v20 = vmax.f32 %v687_v12, 0.0 }
  0xc2   : > { %v567_v4 = vpop.f32.mrf.mxu0 }
  0xc3   : > { %v568_v7 = vadd.f32 %v567_v4, %v453_v1 }
  0xc4   : > { %v444_v5 = vpop.permute.xlu2 %443 }
  0xc5   : > { %v672_v11 = vadd.f32 %v658_v6, %v568_v7  ;;  %v456_v6 = vmul.f32 %v2919_v54, %v2904_v44 }
  0xc7   : > { %v634_v10 = vpop.permute.xlu1 %633  ;;  %v688_v15 = vadd.f32 %v2934_v3, %v672_v11  ;;  %v464_v11 = vmul.f32 %v2919_v54, %v444_v5 }
  0xc8   : > { %v665_v14 = vmul.f32 %v2921_v55, %v634_v10  ;;  %v587_v19 = vpop.f32.mrf.mxu2 }
  0xc9   : > { %v702_v21 = vmax.f32 %v688_v15, 0.0  ;;  %v588_v22 = vadd.f32 %v587_v19, %v461_v13  ;;  %v642_v46 = vpop.permute.xlu0 %641  ;;  %v457_v15 = vmul.f32 %v2919_v54, %v2908_v49 }
  0xca   : > { %v679_v17 = vadd.f32 %v665_v14, %v586_v8  ;;  %v570_v24 = vpop.f32.mrf.mxu0  ;;  %v667_v59 = vmul.f32 %v2921_v55, %v642_v46  ;;  %v2404_v14 = vld [vmem:[#allocation2 + $0x78] sm:$0xff] }
  0xcb   : > { %v715_v25 = vpack.c.bf16 %v702_v21, %v701_v20  ;;  %v680_v26 = vadd.f32 %v666_v16, %v588_v22  ;;  %v571_v29 = vadd.f32 %v570_v24, %v454_v18  ;;  %920 = vmatpush.bf16.msrb.mxu2 %v2404_v14 }
  0xcc   : > { %v695_v23 = vadd.f32 %v2934_v3, %v679_v17  ;;  %v2403_v17 = vld [vmem:[#allocation2 + $0x70] sm:$0xff] }
  0xcd   : > { %796 = vmatmul.bf16.vlgmr.msra.gmra.mxu1 %v715_v25  ;;  %v696_v30 = vadd.f32 %v2934_v3, %v680_v26  ;;  %v673_v36 = vadd.f32 %v659_v28, %v571_v29  ;;  %v650_v22 = vpop.permute.xlu2 %649  ;;  %v2402_v26 = vld [vmem:[#allocation2 + $0x68] sm:$0xff] }
  0xce   : > { %v709_v31 = vmax.f32 %v695_v23, 0.0  ;;  %v662_v23 = vmul.f32 %v2921_v55, %v2910_v50  ;;  %v669_v25 = vmul.f32 %v2921_v55, %v650_v22 }
  0xcf   : > { %v710_v33 = vmax.f32 %v696_v30, 0.0  ;;  %v689_v51 = vadd.f32 %v2934_v3, %v673_v36  ;;  %921 = vmatpush.bf16.msrb.mxu2 %v2403_v17 }
  0xd0   : > { %v434_v27 = vpop.permute.xlu1 %433 }
  0xd1   : > { %v462_v32 = vmul.f32 %v2919_v54, %v434_v27  ;;  %v590_v34 = vpop.f32.mrf.mxu2  ;;  %v719_v37 = vpack.c.bf16 %v710_v33, %v709_v31  ;;  %v703_v0 = vmax.f32 %v689_v51, 0.0  ;;  %v654_v49 = vpop.permute.xlu0 %653  ;;  %v2401_v33 = vld [vmem:[#allocation2 + $0x60] sm:$0xff] }
  0xd2   : > { %v572_v38 = vpop.f32.mrf.mxu0 }
  0xd3   : > { %v573_v42 = vadd.f32 %v572_v38, %v455_v35  ;;  %v591_v45 = vadd.f32 %v590_v34, %v462_v32  ;;  %816 = vmatmul.bf16.vlgmr.msra.gmra.mxu3 %v719_v37  ;;  %v670_v32 = vmul.f32 %v2921_v55, %v654_v49  ;;  %922 = vmatpush.bf16.msrb.mxu2 %v2402_v26 }
  0xd5   : > { %v674_v47 = vadd.f32 %v660_v41, %v573_v42  ;;  %v681_v62 = vadd.f32 %v667_v59, %v591_v45  ;;  %v2400_v45 = vld [vmem:[#allocation2 + $0x58] sm:$0xff]  ;;  %v2399_v59 = vld [vmem:[#allocation2 + $0x50] sm:$0xff] }
  0xd7   : > { %v690_v39 = vadd.f32 %v2934_v3, %v674_v47  ;;  %v697_v2 = vadd.f32 %v2934_v3, %v681_v62  ;;  %923 = vmatpush.bf16.msrb.mxu2 %v2401_v33 }
  0xd9   : > { %v646_v57 = vpop.permute.xlu1 %645  ;;  %v592_v63 = vpop.f32.mrf.mxu2  ;;  %v704_v43 = vmax.f32 %v690_v39, 0.0  ;;  %v711_v13 = vmax.f32 %v697_v2, 0.0  ;;  %v459_v39 = vmul.f32 %v2919_v54, %v2915_v52  ;;  %v2397_v52 = vld [vmem:[#allocation2 + $0x40] sm:$0xff] }
  0xda   : > { %v668_v61 = vmul.f32 %v2921_v55, %v646_v57  ;;  %v593_v1 = vadd.f32 %v592_v63, %v463_v56  ;;  %v575_v4 = vpop.f32.mrf.mxu0  ;;  %v663_v56 = vmul.f32 %v2921_v55, %v2924_v58  ;;  %v2562_v55 = vld [vmem:[%s3166_s6 + $0x1] ss:$0 sm:$0xff] }
  0xdb   : > { %v716_v7 = vpack.c.bf16 %v704_v43, %v703_v0  ;;  %v576_v10 = vadd.f32 %v575_v4, %v456_v6  ;;  %924 = vmatpush.bf16.msrb.mxu2 %v2400_v45  ;;  %v2398_v6 = vld [vmem:[#allocation2 + $0x48] sm:$0xff] }
  0xdc   : > { %v682_v8 = vadd.f32 %v668_v61, %v593_v1 }
  0xdd   : > { %801 = vmatmul.bf16.gmra.mxu1 %v716_v7  ;;  %v675_v18 = vadd.f32 %v661_v9, %v576_v10 }
  0xde   : > { %v698_v12 = vadd.f32 %v2934_v3, %v682_v8 }
  0xdf   : > { %v691_v28 = vadd.f32 %v2934_v3, %v675_v18  ;;  %925 = vmatpush.bf16.msrb.mxu2 %v2399_v59  ;;  %v2407_v59 = vld [vmem:[#allocation2 + $0x90] sm:$0xff] }
  0xe0   : > { %v712_v16 = vmax.f32 %v698_v12, 0.0 }
  0xe1   : > { %v595_v44 = vpop.f32.mrf.mxu2  ;;  %v705_v34 = vmax.f32 %v691_v28, 0.0 }
  0xe2   : > { %v596_v19 = vadd.f32 %v595_v44, %v464_v11  ;;  %v720_v20 = vpack.c.bf16 %v712_v16, %v711_v13  ;;  %v449_v21 = vpop.permute.xlu1 %448  ;;  %v577_v48 = vpop.f32.mrf.mxu0 }
  0xe3   : > { %v578_v24 = vadd.f32 %v577_v48, %v457_v15  ;;  %v465_v29 = vmul.f32 %v2919_v54, %v449_v21  ;;  %926 = vmatpush.bf16.msrb.mxu2 %v2398_v6 }
  0xe4   : > { %821 = vmatmul.bf16.gmra.mxu3 %v720_v20  ;;  %v683_v30 = vadd.f32 %v669_v25, %v596_v19 }
  0xe5   : > { %v676_v27 = vadd.f32 %v662_v23, %v578_v24 }
  0xe6   : > { %v699_v37 = vadd.f32 %v2934_v3, %v683_v30 }
  0xe7   : > { %v692_v31 = vadd.f32 %v2934_v3, %v676_v27  ;;  %927 = vmatpush.bf16.msrb.mxu2 %v2397_v52 }
  0xe8   : > { %v713_v51 = vmax.f32 %v699_v37, 0.0  ;;  %v2412_v37 = vld [vmem:[#allocation2 + $0xb8] sm:$0xff] }
  0xe9   : > { %v597_v50 = vpop.f32.mrf.mxu2  ;;  %v706_v35 = vmax.f32 %v692_v31, 0.0  ;;  %1052 = vmatpush.bf16.msrb.mxu3 %v2412_v37 }
  0xea   : > { %v598_v36 = vadd.f32 %v597_v50, %v465_v29  ;;  %v580_v38 = vpop.f32.mrf.mxu0 }
  0xeb   : > { %v717_v41 = vpack.c.bf16 %v706_v35, %v705_v34  ;;  %v581_v46 = vadd.f32 %v580_v38, %v458_v40  ;;  %v2411_v38 = vld [vmem:[#allocation2 + $0xb0] sm:$0xff] }
  0xec   : > { %v684_v42 = vadd.f32 %v670_v32, %v598_v36 }
  0xed   : > { %806 = vmatmul.bf16.gmra.mxu1 %v717_v41  ;;  %v677_v61 = vadd.f32 %v663_v56, %v581_v46  ;;  %1053 = vmatpush.bf16.msrb.mxu3 %v2411_v38  ;;  %v2415_v38 = vld [vmem:[#allocation2 + $0xd0] sm:$0xff] }
  0xee   : > { %v700_v47 = vadd.f32 %v2934_v3, %v684_v42  ;;  %v2410_v42 = vld [vmem:[#allocation2 + $0xa8] sm:$0xff] }
  0xef   : > { %v693_v1 = vadd.f32 %v2934_v3, %v677_v61 }
  0xf0   : > { %v714_v57 = vmax.f32 %v700_v47, 0.0 }
  0xf1   : > { %v707_v2 = vmax.f32 %v693_v1, 0.0  ;;  %1054 = vmatpush.bf16.msrb.mxu3 %v2410_v42  ;;  %v2405_v1 = vld [vmem:[#allocation2 + $0x80] sm:$0xff] }
  0xf2   : > { %v721_v62 = vpack.c.bf16 %v714_v57, %v713_v51  ;;  %v582_v63 = vpop.f32.mrf.mxu0  ;;  %v2409_v51 = vld [vmem:[#allocation2 + $0xa0] sm:$0xff]  ;;  %v2408_v57 = vld [vmem:[#allocation2 + $0x98] sm:$0xff] }
  0xf3   : > { %v583_v0 = vadd.f32 %v582_v63, %v459_v39 }
  0xf4   : > { %826 = vmatmul.bf16.gmra.mxu3 %v721_v62 }
  0xf5   : > { %v678_v43 = vadd.f32 %v664_v53, %v583_v0  ;;  %1055 = vmatpush.bf16.msrb.mxu3 %v2409_v51 }
  0xf7   : > { %v694_v58 = vadd.f32 %v2934_v3, %v678_v43  ;;  %v2406_v43 = vld [vmem:[#allocation2 + $0x88] sm:$0xff] }
  0xf9   : > { %v708_v4 = vmax.f32 %v694_v58, 0.0  ;;  %1056 = vmatpush.bf16.msrb.mxu3 %v2408_v57 }
  0xfb   : > { %v718_v5 = vpack.c.bf16 %v708_v4, %v707_v2  ;;  %v2990_v2 = vld [vmem:[%s3166_s6 + $0x2] ss:$0 sm:$0xff] }
  0xfd   : > { %811 = vmatmul.bf16.gmra.mxu1 %v718_v5  ;;  %1057 = vmatpush.bf16.msrb.mxu3 %v2407_v59 }
 0x101   : > { %1058 = vmatpush.bf16.msrb.mxu3 %v2406_v43 }
 0x105   : > { %1059 = vmatpush.bf16.msrb.mxu3 %v2405_v1 }
 0x14a   : > { %v797_v54 = vpop.f32.mrf.mxu1 }
 0x14b   : > { %v798_v60 = vadd.f32 %v2562_v55, %v797_v54 }
 0x14d   : > { %v832_v9 = vmax.f32 %v798_v60, 0.0 }
 0x152   : > { %v799_v7 = vpop.f32.mrf.mxu1 }
 0x153   : > { %v800_v8 = vadd.f32 %v2562_v55, %v799_v7 }
 0x155   : > { %v833_v10 = vmax.f32 %v800_v8, 0.0 }
 0x156   : > { %v817_v23 = vpop.f32.mrf.mxu3 }
 0x157   : > { %v846_v11 = vpack.c.bf16 %v833_v10, %v832_v9  ;;  %v818_v32 = vadd.f32 %v2562_v55, %v817_v23 }
 0x159   : > { %928 = vmatmul.bf16.vlgmr.msrb.gmra.mxu2 %v846_v11  ;;  %v840_v50 = vmax.f32 %v818_v32, 0.0  ;;  %v2418_v32 = vld [vmem:[#allocation2 + $0xe8] sm:$0xff] }
 0x15a   : > { %v802_v3 = vpop.f32.mrf.mxu1 }
 0x15b   : > { %v803_v12 = vadd.f32 %v2562_v55, %v802_v3 }
 0x15d   : > { %v834_v15 = vmax.f32 %v803_v12, 0.0 }
 0x15e   : > { %v819_v27 = vpop.f32.mrf.mxu3 }
 0x15f   : > { %v820_v33 = vadd.f32 %v2562_v55, %v819_v27 }
 0x161   : > { %v841_v34 = vmax.f32 %v820_v33, 0.0 }
 0x162   : > { %v804_v13 = vpop.f32.mrf.mxu1 }
 0x163   : > { %v805_v14 = vadd.f32 %v2562_v55, %v804_v13  ;;  %v850_v35 = vpack.c.bf16 %v841_v34, %v840_v50  ;;  %v2417_v50 = vld [vmem:[#allocation2 + $0xe0] sm:$0xff]  ;;  %v2416_v34 = vld [vmem:[#allocation2 + $0xd8] sm:$0xff] }
 0x165   : > { %v835_v16 = vmax.f32 %v805_v14, 0.0 }
 0x167   : > { %v847_v17 = vpack.c.bf16 %v835_v16, %v834_v15  ;;  %v822_v31 = vpop.f32.mrf.mxu3 }
 0x168   : > { %v823_v40 = vadd.f32 %v2562_v55, %v822_v31 }
 0x169   : > { %933 = vmatmul.bf16.gmra.mxu2 %v847_v17 }
 0x16a   : > { %v807_v44 = vpop.f32.mrf.mxu1  ;;  %v842_v46 = vmax.f32 %v823_v40, 0.0 }
 0x16b   : > { %v808_v18 = vadd.f32 %v2562_v55, %v807_v44 }
 0x16d   : > { %v836_v21 = vmax.f32 %v808_v18, 0.0 }
 0x16f   : > { %v824_v36 = vpop.f32.mrf.mxu3 }
 0x170   : > { %v825_v41 = vadd.f32 %v2562_v55, %v824_v36 }
 0x172   : > { %v809_v19 = vpop.f32.mrf.mxu1  ;;  %v843_v47 = vmax.f32 %v825_v41, 0.0 }
 0x173   : > { %v810_v20 = vadd.f32 %v2562_v55, %v809_v19 }
 0x174   : > { %v851_v56 = vpack.c.bf16 %v843_v47, %v842_v46 }
 0x175   : > { %v837_v48 = vmax.f32 %v810_v20, 0.0 }
 0x177   : > { %v848_v22 = vpack.c.bf16 %v837_v48, %v836_v21  ;;  %v827_v45 = vpop.f32.mrf.mxu3 }
 0x178   : > { %v828_v53 = vadd.f32 %v2562_v55, %v827_v45  ;;  %v2414_v45 = vld [vmem:[#allocation2 + $0xc8] sm:$0xff] }
 0x179   : > { %938 = vmatmul.bf16.gmra.mxu2 %v848_v22 }
 0x17a   : > { %v812_v24 = vpop.f32.mrf.mxu1  ;;  %v844_v62 = vmax.f32 %v828_v53, 0.0  ;;  %v2413_v53 = vld [vmem:[#allocation2 + $0xc0] sm:$0xff] }
 0x17b   : > { %v813_v25 = vadd.f32 %v2562_v55, %v812_v24 }
 0x17d   : > { %v838_v28 = vmax.f32 %v813_v25, 0.0  ;;  %v2420_v25 = vld [vmem:[#allocation2 + $0xf8] sm:$0xff] }
 0x17e   : > { %1184 = vmatpush.bf16.msrb.mxu0 %v2420_v25 }
 0x17f   : > { %v829_v39 = vpop.f32.mrf.mxu3 }
 0x180   : > { %v830_v61 = vadd.f32 %v2562_v55, %v829_v39 }
 0x182   : > { %v814_v26 = vpop.f32.mrf.mxu1  ;;  %v845_v63 = vmax.f32 %v830_v61, 0.0 }
 0x183   : > { %v815_v49 = vadd.f32 %v2562_v55, %v814_v26 }
 0x184   : > { %v852_v0 = vpack.c.bf16 %v845_v63, %v844_v62  ;;  %v3009_v62 = vld [vmem:[%s3166_s6 + $0x3] ss:$0 sm:$0xff] }
 0x185   : > { %v839_v29 = vmax.f32 %v815_v49, 0.0 }
 0x187   : > { %v849_v30 = vpack.c.bf16 %v839_v29, %v838_v28 }
 0x189   : > { %943 = vmatmul.bf16.gmra.mxu2 %v849_v30  ;;  %v2419_v30 = vld [vmem:[#allocation2 + $0xf0] sm:$0xff] }
 0x18a   : > { %1185 = vmatpush.bf16.msrb.mxu0 %v2419_v30  ;;  %v2423_v30 = vld [vmem:[#allocation2 + $0x110] sm:$0xff] }
 0x18e   : > { %1186 = vmatpush.bf16.msrb.mxu0 %v2418_v32 }
 0x192   : > { %1187 = vmatpush.bf16.msrb.mxu0 %v2417_v50  ;;  %v2422_v50 = vld [vmem:[#allocation2 + $0x108] sm:$0xff] }
 0x196   : > { %1188 = vmatpush.bf16.msrb.mxu0 %v2416_v34 }
 0x199   : > { %948 = vmatmul.bf16.gmra.mxu2 %v850_v35 }
 0x19a   : > { %1189 = vmatpush.bf16.msrb.mxu0 %v2415_v38 }
 0x19e   : > { %1190 = vmatpush.bf16.msrb.mxu0 %v2414_v45 }
 0x1a2   : > { %1191 = vmatpush.bf16.msrb.mxu0 %v2413_v53 }
 0x1a9   : > { %953 = vmatmul.bf16.gmra.mxu2 %v851_v56 }
 0x1b9   : > { %958 = vmatmul.bf16.gmra.mxu2 %v852_v0 }
 0x1dc   : > { %v929_v58 = vpop.f32.mrf.mxu2 }
 0x1dd   : > { %v930_v4 = vadd.f32 %v2990_v2, %v929_v58 }
 0x1df   : > { %v964_v52 = vmax.f32 %v930_v4, 0.0 }
 0x1e4   : > { %v931_v5 = vpop.f32.mrf.mxu2 }
 0x1e5   : > { %v932_v6 = vadd.f32 %v2990_v2, %v931_v5 }
 0x1e7   : > { %v965_v54 = vmax.f32 %v932_v6, 0.0 }
 0x1e9   : > { %v978_v55 = vpack.c.bf16 %v965_v54, %v964_v52 }
 0x1eb   : > { %1060 = vmatmul.bf16.vlgmr.msrb.gmra.mxu3 %v978_v55 }
 0x1ec   : > { %v934_v60 = vpop.f32.mrf.mxu2 }
 0x1ed   : > { %v935_v7 = vadd.f32 %v2990_v2, %v934_v60 }
 0x1ef   : > { %v966_v10 = vmax.f32 %v935_v7, 0.0 }
 0x1f4   : > { %v936_v8 = vpop.f32.mrf.mxu2 }
 0x1f5   : > { %v937_v9 = vadd.f32 %v2990_v2, %v936_v8 }
 0x1f7   : > { %v967_v11 = vmax.f32 %v937_v9, 0.0 }
 0x1f9   : > { %v979_v3 = vpack.c.bf16 %v967_v11, %v966_v10 }
 0x1fb   : > { %1065 = vmatmul.bf16.gmra.mxu3 %v979_v3 }
 0x1fc   : > { %v939_v12 = vpop.f32.mrf.mxu2 }
 0x1fd   : > { %v940_v13 = vadd.f32 %v2990_v2, %v939_v12 }
 0x1ff   : > { %v968_v16 = vmax.f32 %v940_v13, 0.0 }
 0x204   : > { %v941_v14 = vpop.f32.mrf.mxu2 }
 0x205   : > { %v942_v15 = vadd.f32 %v2990_v2, %v941_v14 }
 0x207   : > { %v969_v17 = vmax.f32 %v942_v15, 0.0 }
 0x209   : > { %v980_v44 = vpack.c.bf16 %v969_v17, %v968_v16 }
 0x20b   : > { %1070 = vmatmul.bf16.gmra.mxu3 %v980_v44 }
 0x20c   : > { %v944_v18 = vpop.f32.mrf.mxu2 }
 0x20d   : > { %v945_v19 = vadd.f32 %v2990_v2, %v944_v18  ;;  %v2428_v18 = vld [vmem:[#allocation2 + $0x138] sm:$0xff] }
 0x20e   : > { %1316 = vmatpush.bf16.msrb.mxu1 %v2428_v18  ;;  %v2432_v18 = vld [vmem:[#allocation2 + $0x158] sm:$0xff] }
 0x20f   : > { %v970_v48 = vmax.f32 %v945_v19, 0.0 }
 0x214   : > { %v946_v20 = vpop.f32.mrf.mxu2 }
 0x215   : > { %v947_v21 = vadd.f32 %v2990_v2, %v946_v20 }
 0x217   : > { %v971_v22 = vmax.f32 %v947_v21, 0.0  ;;  %v2427_v21 = vld [vmem:[#allocation2 + $0x130] sm:$0xff] }
 0x218   : > { %1317 = vmatpush.bf16.msrb.mxu1 %v2427_v21 }
 0x219   : > { %v981_v23 = vpack.c.bf16 %v971_v22, %v970_v48 }
 0x21b   : > { %1075 = vmatmul.bf16.gmra.mxu3 %v981_v23 }
 0x21c   : > { %v949_v24 = vpop.f32.mrf.mxu2 }
 0x21d   : > { %v950_v26 = vadd.f32 %v2990_v2, %v949_v24 }
 0x21f   : > { %v972_v28 = vmax.f32 %v950_v26, 0.0  ;;  %v2426_v26 = vld [vmem:[#allocation2 + $0x128] sm:$0xff] }
 0x220   : > { %1318 = vmatpush.bf16.msrb.mxu1 %v2426_v26  ;;  %v2430_v26 = vld [vmem:[#allocation2 + $0x148] sm:$0xff] }
 0x224   : > { %v951_v49 = vpop.f32.mrf.mxu2 }
 0x225   : > { %v952_v27 = vadd.f32 %v2990_v2, %v951_v49 }
 0x227   : > { %v973_v29 = vmax.f32 %v952_v27, 0.0  ;;  %v2425_v27 = vld [vmem:[#allocation2 + $0x120] sm:$0xff] }
 0x228   : > { %1319 = vmatpush.bf16.msrb.mxu1 %v2425_v27 }
 0x229   : > { %v982_v31 = vpack.c.bf16 %v973_v29, %v972_v28  ;;  %v2424_v29 = vld [vmem:[#allocation2 + $0x118] sm:$0xff] }
 0x22b   : > { %1080 = vmatmul.bf16.gmra.mxu3 %v982_v31 }
 0x22c   : > { %v954_v33 = vpop.f32.mrf.mxu2  ;;  %1320 = vmatpush.bf16.msrb.mxu1 %v2424_v29 }
 0x22d   : > { %v955_v35 = vadd.f32 %v2990_v2, %v954_v33 }
 0x22f   : > { %v974_v40 = vmax.f32 %v955_v35, 0.0 }
 0x230   : > { %1321 = vmatpush.bf16.msrb.mxu1 %v2423_v30 }
 0x234   : > { %v956_v36 = vpop.f32.mrf.mxu2  ;;  %1322 = vmatpush.bf16.msrb.mxu1 %v2422_v50 }
 0x235   : > { %v957_v37 = vadd.f32 %v2990_v2, %v956_v36 }
 0x237   : > { %v975_v41 = vmax.f32 %v957_v37, 0.0 }
 0x239   : > { %v983_v42 = vpack.c.bf16 %v975_v41, %v974_v40 }
 0x23b   : > { %1085 = vmatmul.bf16.gmra.mxu3 %v983_v42 }
 0x23c   : > { %v959_v46 = vpop.f32.mrf.mxu2 }
 0x23d   : > { %v960_v47 = vadd.f32 %v2990_v2, %v959_v46 }
 0x23f   : > { %v976_v57 = vmax.f32 %v960_v47, 0.0  ;;  %v2421_v47 = vld [vmem:[#allocation2 + $0x100] sm:$0xff] }
 0x240   : > { %1323 = vmatpush.bf16.msrb.mxu1 %v2421_v47 }
 0x244   : > { %v961_v51 = vpop.f32.mrf.mxu2 }
 0x245   : > { %v962_v56 = vadd.f32 %v2990_v2, %v961_v51 }
 0x247   : > { %v977_v59 = vmax.f32 %v962_v56, 0.0  ;;  %v3028_v56 = vld [vmem:[%s3166_s6 + $0x4] ss:$0 sm:$0xff] }
 0x249   : > { %v984_v39 = vpack.c.bf16 %v977_v59, %v976_v57 }
 0x24b   : > { %1090 = vmatmul.bf16.gmra.mxu3 %v984_v39 }
 0x26e   : > { %v1061_v61 = vpop.f32.mrf.mxu3 }
 0x26f   : > { %v1062_v63 = vadd.f32 %v3009_v62, %v1061_v61 }
 0x271   : > { %v1096_v1 = vmax.f32 %v1062_v63, 0.0 }
 0x276   : > { %v1063_v0 = vpop.f32.mrf.mxu3 }
 0x277   : > { %v1064_v43 = vadd.f32 %v3009_v62, %v1063_v0 }
 0x279   : > { %v1097_v58 = vmax.f32 %v1064_v43, 0.0 }
 0x27b   : > { %v1110_v2 = vpack.c.bf16 %v1097_v58, %v1096_v1 }
 0x27d   : > { %1192 = vmatmul.bf16.vlgmr.msrb.gmra.mxu0 %v1110_v2 }
 0x27e   : > { %v1066_v4 = vpop.f32.mrf.mxu3 }
 0x27f   : > { %v1067_v5 = vadd.f32 %v3009_v62, %v1066_v4 }
 0x281   : > { %v1098_v54 = vmax.f32 %v1067_v5, 0.0  ;;  %v2435_v5 = vld [vmem:[#allocation2 + $0x170] sm:$0xff] }
 0x286   : > { %v1068_v6 = vpop.f32.mrf.mxu3 }
 0x287   : > { %v1069_v52 = vadd.f32 %v3009_v62, %v1068_v6 }
 0x289   : > { %v1099_v55 = vmax.f32 %v1069_v52, 0.0 }
 0x28b   : > { %v1111_v60 = vpack.c.bf16 %v1099_v55, %v1098_v54  ;;  %v2434_v54 = vld [vmem:[#allocation2 + $0x168] sm:$0xff] }
 0x28d   : > { %1197 = vmatmul.bf16.gmra.mxu0 %v1111_v60 }
 0x28e   : > { %v1071_v7 = vpop.f32.mrf.mxu3 }
 0x28f   : > { %v1072_v8 = vadd.f32 %v3009_v62, %v1071_v7 }
 0x291   : > { %v1100_v11 = vmax.f32 %v1072_v8, 0.0 }
 0x296   : > { %v1073_v9 = vpop.f32.mrf.mxu3 }
 0x297   : > { %v1074_v10 = vadd.f32 %v3009_v62, %v1073_v9 }
 0x299   : > { %v1101_v3 = vmax.f32 %v1074_v10, 0.0 }
 0x29b   : > { %v1112_v12 = vpack.c.bf16 %v1101_v3, %v1100_v11  ;;  %v2433_v3 = vld [vmem:[#allocation2 + $0x160] sm:$0xff] }
 0x29d   : > { %1202 = vmatmul.bf16.gmra.mxu0 %v1112_v12 }
 0x29e   : > { %v1076_v13 = vpop.f32.mrf.mxu3 }
 0x29f   : > { %v1077_v14 = vadd.f32 %v3009_v62, %v1076_v13 }
 0x2a1   : > { %v1102_v17 = vmax.f32 %v1077_v14, 0.0 }
 0x2a6   : > { %v1078_v15 = vpop.f32.mrf.mxu3 }
 0x2a7   : > { %v1079_v16 = vadd.f32 %v3009_v62, %v1078_v15 }
 0x2a9   : > { %v1103_v44 = vmax.f32 %v1079_v16, 0.0 }
 0x2ab   : > { %v1113_v19 = vpack.c.bf16 %v1103_v44, %v1102_v17 }
 0x2ad   : > { %1207 = vmatmul.bf16.gmra.mxu0 %v1113_v19 }
 0x2ae   : > { %v1081_v20 = vpop.f32.mrf.mxu3 }
 0x2af   : > { %v1082_v48 = vadd.f32 %v3009_v62, %v1081_v20 }
 0x2b1   : > { %v1104_v24 = vmax.f32 %v1082_v48, 0.0 }
 0x2b6   : > { %v1083_v22 = vpop.f32.mrf.mxu3 }
 0x2b7   : > { %v1084_v23 = vadd.f32 %v3009_v62, %v1083_v22 }
 0x2b9   : > { %v1105_v25 = vmax.f32 %v1084_v23, 0.0 }
 0x2bb   : > { %v1114_v49 = vpack.c.bf16 %v1105_v25, %v1104_v24  ;;  %v2431_v24 = vld [vmem:[#allocation2 + $0x150] sm:$0xff] }
 0x2bd   : > { %1212 = vmatmul.bf16.gmra.mxu0 %v1114_v49 }
 0x2be   : > { %v1086_v28 = vpop.f32.mrf.mxu3 }
 0x2bf   : > { %v1087_v31 = vadd.f32 %v3009_v62, %v1086_v28 }
 0x2c1   : > { %v1106_v34 = vmax.f32 %v1087_v31, 0.0 }
 0x2c6   : > { %v1088_v32 = vpop.f32.mrf.mxu3 }
 0x2c7   : > { %v1089_v33 = vadd.f32 %v3009_v62, %v1088_v32 }
 0x2c9   : > { %v1107_v35 = vmax.f32 %v1089_v33, 0.0 }
 0x2cb   : > { %v1115_v36 = vpack.c.bf16 %v1107_v35, %v1106_v34 }
 0x2cd   : > { %1217 = vmatmul.bf16.gmra.mxu0 %v1115_v36 }
 0x2ce   : > { %v1091_v37 = vpop.f32.mrf.mxu3 }
 0x2cf   : > { %v1092_v38 = vadd.f32 %v3009_v62, %v1091_v37 }
 0x2d1   : > { %v1108_v42 = vmax.f32 %v1092_v38, 0.0  ;;  %v2429_v38 = vld [vmem:[#allocation2 + $0x140] sm:$0xff] }
 0x2d6   : > { %v1093_v40 = vpop.f32.mrf.mxu3 }
 0x2d7   : > { %v1094_v41 = vadd.f32 %v3009_v62, %v1093_v40  ;;  %v2436_v62 = vld [vmem:[#allocation2 + $0x178] sm:$0xff] }
 0x2d8   : > { %1448 = vmatpush.bf16.msra.mxu2 %v2436_v62 }
 0x2d9   : > { %v1109_v45 = vmax.f32 %v1094_v41, 0.0  ;;  %v3047_v41 = vld [vmem:[%s3166_s6 + $0x5] ss:$0 sm:$0xff] }
 0x2db   : > { %v1116_v46 = vpack.c.bf16 %v1109_v45, %v1108_v42 }
 0x2dc   : > { %1449 = vmatpush.bf16.msra.mxu2 %v2435_v5 }
 0x2dd   : > { %1222 = vmatmul.bf16.gmra.mxu0 %v1116_v46 }
 0x2e0   : > { %1450 = vmatpush.bf16.msra.mxu2 %v2434_v54  ;;  %v2442_v54 = vld [vmem:[#allocation2 + $0x1a8] sm:$0xff] }
 0x2e4   : > { %1451 = vmatpush.bf16.msra.mxu2 %v2433_v3  ;;  %v2441_v3 = vld [vmem:[#allocation2 + $0x1a0] sm:$0xff] }
 0x2e8   : > { %1452 = vmatpush.bf16.msra.mxu2 %v2432_v18  ;;  %v2440_v18 = vld [vmem:[#allocation2 + $0x198] sm:$0xff] }
 0x2ec   : > { %1453 = vmatpush.bf16.msra.mxu2 %v2431_v24 }
 0x2f0   : > { %1454 = vmatpush.bf16.msra.mxu2 %v2430_v26 }
 0x2f4   : > { %1455 = vmatpush.bf16.msra.mxu2 %v2429_v38 }
 0x2fa   : > { %v1193_v51 = vpop.f32.mrf.mxu0 }
 0x2fb   : > { %v1194_v57 = vadd.f32 %v3028_v56, %v1193_v51 }
 0x2fd   : > { %v1228_v53 = vmax.f32 %v1194_v57, 0.0 }
 0x302   : > { %v1195_v59 = vpop.f32.mrf.mxu0 }
 0x303   : > { %v1196_v39 = vadd.f32 %v3028_v56, %v1195_v59  ;;  %v2444_v59 = vld [vmem:[#allocation2 + $0x1b8] sm:$0xff] }
 0x304   : > { %1580 = vmatpush.bf16.msra.mxu3 %v2444_v59 }
 0x305   : > { %v1229_v61 = vmax.f32 %v1196_v39, 0.0 }
 0x307   : > { %v1242_v63 = vpack.c.bf16 %v1229_v61, %v1228_v53 }
 0x309   : > { %1324 = vmatmul.bf16.vlgmr.msrb.gmra.mxu1 %v1242_v63 }
 0x30a   : > { %v1198_v0 = vpop.f32.mrf.mxu0 }
 0x30b   : > { %v1199_v43 = vadd.f32 %v3028_v56, %v1198_v0 }
 0x30d   : > { %v1230_v2 = vmax.f32 %v1199_v43, 0.0  ;;  %v2443_v43 = vld [vmem:[#allocation2 + $0x1b0] sm:$0xff] }
 0x30e   : > { %1581 = vmatpush.bf16.msra.mxu3 %v2443_v43 }
 0x312   : > { %v1200_v1 = vpop.f32.mrf.mxu0  ;;  %1582 = vmatpush.bf16.msra.mxu3 %v2442_v54 }
 0x313   : > { %v1201_v58 = vadd.f32 %v3028_v56, %v1200_v1 }
 0x315   : > { %v1231_v4 = vmax.f32 %v1201_v58, 0.0 }
 0x316   : > { %1583 = vmatpush.bf16.msra.mxu3 %v2441_v3 }
 0x317   : > { %v1243_v6 = vpack.c.bf16 %v1231_v4, %v1230_v2 }
 0x319   : > { %1329 = vmatmul.bf16.gmra.mxu1 %v1243_v6 }
 0x31a   : > { %v1203_v52 = vpop.f32.mrf.mxu0  ;;  %1584 = vmatpush.bf16.msra.mxu3 %v2440_v18 }
 0x31b   : > { %v1204_v55 = vadd.f32 %v3028_v56, %v1203_v52 }
 0x31d   : > { %v1232_v8 = vmax.f32 %v1204_v55, 0.0 }
 0x322   : > { %v1205_v60 = vpop.f32.mrf.mxu0 }
 0x323   : > { %v1206_v7 = vadd.f32 %v3028_v56, %v1205_v60 }
 0x325   : > { %v1233_v9 = vmax.f32 %v1206_v7, 0.0 }
 0x327   : > { %v1244_v10 = vpack.c.bf16 %v1233_v9, %v1232_v8 }
 0x329   : > { %1334 = vmatmul.bf16.gmra.mxu1 %v1244_v10 }
 0x32a   : > { %v1208_v11 = vpop.f32.mrf.mxu0 }
 0x32b   : > { %v1209_v12 = vadd.f32 %v3028_v56, %v1208_v11 }
 0x32d   : > { %v1234_v15 = vmax.f32 %v1209_v12, 0.0 }
 0x332   : > { %v1210_v13 = vpop.f32.mrf.mxu0 }
 0x333   : > { %v1211_v14 = vadd.f32 %v3028_v56, %v1210_v13 }
 0x335   : > { %v1235_v16 = vmax.f32 %v1211_v14, 0.0 }
 0x337   : > { %v1245_v17 = vpack.c.bf16 %v1235_v16, %v1234_v15 }
 0x339   : > { %1339 = vmatmul.bf16.gmra.mxu1 %v1245_v17 }
 0x33a   : > { %v1213_v44 = vpop.f32.mrf.mxu0 }
 0x33b   : > { %v1214_v19 = vadd.f32 %v3028_v56, %v1213_v44 }
 0x33d   : > { %v1236_v48 = vmax.f32 %v1214_v19, 0.0  ;;  %v2439_v19 = vld [vmem:[#allocation2 + $0x190] sm:$0xff] }
 0x33e   : > { %1585 = vmatpush.bf16.msra.mxu3 %v2439_v19 }
 0x342   : > { %v1215_v20 = vpop.f32.mrf.mxu0 }
 0x343   : > { %v1216_v21 = vadd.f32 %v3028_v56, %v1215_v20 }
 0x345   : > { %v1237_v22 = vmax.f32 %v1216_v21, 0.0  ;;  %v2438_v21 = vld [vmem:[#allocation2 + $0x188] sm:$0xff] }
 0x346   : > { %1586 = vmatpush.bf16.msra.mxu3 %v2438_v21 }
 0x347   : > { %v1246_v23 = vpack.c.bf16 %v1237_v22, %v1236_v48 }
 0x349   : > { %1344 = vmatmul.bf16.gmra.mxu1 %v1246_v23 }
 0x34a   : > { %v1218_v25 = vpop.f32.mrf.mxu0 }
 0x34b   : > { %v1219_v49 = vadd.f32 %v3028_v56, %v1218_v25 }
 0x34d   : > { %v1238_v29 = vmax.f32 %v1219_v49, 0.0 }
 0x352   : > { %v1220_v27 = vpop.f32.mrf.mxu0 }
 0x353   : > { %v1221_v28 = vadd.f32 %v3028_v56, %v1220_v27 }
 0x355   : > { %v1239_v30 = vmax.f32 %v1221_v28, 0.0 }
 0x357   : > { %v1247_v31 = vpack.c.bf16 %v1239_v30, %v1238_v29 }
 0x359   : > { %1349 = vmatmul.bf16.gmra.mxu1 %v1247_v31 }
 0x35a   : > { %v1223_v32 = vpop.f32.mrf.mxu0 }
 0x35b   : > { %v1224_v33 = vadd.f32 %v3028_v56, %v1223_v32 }
 0x35d   : > { %v1240_v35 = vmax.f32 %v1224_v33, 0.0  ;;  %v2437_v33 = vld [vmem:[#allocation2 + $0x180] sm:$0xff] }
 0x35e   : > { %1587 = vmatpush.bf16.msra.mxu3 %v2437_v33 }
 0x362   : > { %v1225_v50 = vpop.f32.mrf.mxu0 }
 0x363   : > { %v1226_v34 = vadd.f32 %v3028_v56, %v1225_v50 }
 0x365   : > { %v1241_v36 = vmax.f32 %v1226_v34, 0.0  ;;  %v3066_v34 = vld [vmem:[%s3166_s6 + $0x6] ss:$0 sm:$0xff] }
 0x367   : > { %v1248_v37 = vpack.c.bf16 %v1241_v36, %v1240_v35 }
 0x369   : > { %1354 = vmatmul.bf16.gmra.mxu1 %v1248_v37 }
 0x386   : > { %v1325_v40 = vpop.f32.mrf.mxu1 }
 0x387   : > { %v1326_v42 = vadd.f32 %v3047_v41, %v1325_v40 }
 0x389   : > { %v1360_v47 = vmax.f32 %v1326_v42, 0.0 }
 0x38e   : > { %v1327_v45 = vpop.f32.mrf.mxu1 }
 0x38f   : > { %v1328_v46 = vadd.f32 %v3047_v41, %v1327_v45  ;;  %v2452_v45 = vld [vmem:[#allocation2 + $0x1f8] sm:$0xff] }
 0x390   : > { %1712 = vmatpush.bf16.msra.mxu0 %v2452_v45 }
 0x391   : > { %v1361_v51 = vmax.f32 %v1328_v46, 0.0 }
 0x393   : > { %v1374_v56 = vpack.c.bf16 %v1361_v51, %v1360_v47 }
 0x395   : > { %1456 = vmatmul.bf16.vlgmr.msra.gmra.mxu2 %v1374_v56 }
 0x396   : > { %v1330_v57 = vpop.f32.mrf.mxu1 }
 0x397   : > { %v1331_v39 = vadd.f32 %v3047_v41, %v1330_v57 }
 0x399   : > { %v1362_v62 = vmax.f32 %v1331_v39, 0.0  ;;  %v2451_v39 = vld [vmem:[#allocation2 + $0x1f0] sm:$0xff] }
 0x39a   : > { %1713 = vmatpush.bf16.msra.mxu0 %v2451_v39 }
 0x39e   : > { %v1332_v53 = vpop.f32.mrf.mxu1 }
 0x39f   : > { %v1333_v61 = vadd.f32 %v3047_v41, %v1332_v53 }
 0x3a1   : > { %v1363_v63 = vmax.f32 %v1333_v61, 0.0 }
 0x3a3   : > { %v1375_v0 = vpack.c.bf16 %v1363_v63, %v1362_v62 }
 0x3a5   : > { %1461 = vmatmul.bf16.gmra.mxu2 %v1375_v0 }
 0x3a6   : > { %v1335_v1 = vpop.f32.mrf.mxu1 }
 0x3a7   : > { %v1336_v58 = vadd.f32 %v3047_v41, %v1335_v1 }
 0x3a9   : > { %v1364_v5 = vmax.f32 %v1336_v58, 0.0  ;;  %v2450_v58 = vld [vmem:[#allocation2 + $0x1e8] sm:$0xff] }
 0x3aa   : > { %1714 = vmatpush.bf16.msra.mxu0 %v2450_v58 }
 0x3ae   : > { %v1337_v2 = vpop.f32.mrf.mxu1 }
 0x3af   : > { %v1338_v4 = vadd.f32 %v3047_v41, %v1337_v2 }
 0x3b1   : > { %v1365_v6 = vmax.f32 %v1338_v4, 0.0 }
 0x3b3   : > { %v1376_v52 = vpack.c.bf16 %v1365_v6, %v1364_v5 }
 0x3b5   : > { %1466 = vmatmul.bf16.gmra.mxu2 %v1376_v52 }
 0x3b6   : > { %v1340_v55 = vpop.f32.mrf.mxu1 }
 0x3b7   : > { %v1341_v60 = vadd.f32 %v3047_v41, %v1340_v55 }
 0x3b9   : > { %v1366_v9 = vmax.f32 %v1341_v60, 0.0  ;;  %v2449_v60 = vld [vmem:[#allocation2 + $0x1e0] sm:$0xff] }
 0x3ba   : > { %1715 = vmatpush.bf16.msra.mxu0 %v2449_v60 }
 0x3be   : > { %v1342_v7 = vpop.f32.mrf.mxu1 }
 0x3bf   : > { %v1343_v8 = vadd.f32 %v3047_v41, %v1342_v7 }
 0x3c1   : > { %v1367_v10 = vmax.f32 %v1343_v8, 0.0 }
 0x3c3   : > { %v1377_v11 = vpack.c.bf16 %v1367_v10, %v1366_v9 }
 0x3c5   : > { %1471 = vmatmul.bf16.gmra.mxu2 %v1377_v11 }
 0x3c6   : > { %v1345_v12 = vpop.f32.mrf.mxu1 }
 0x3c7   : > { %v1346_v13 = vadd.f32 %v3047_v41, %v1345_v12 }
 0x3c9   : > { %v1368_v16 = vmax.f32 %v1346_v13, 0.0  ;;  %v2448_v13 = vld [vmem:[#allocation2 + $0x1d8] sm:$0xff] }
 0x3ca   : > { %1716 = vmatpush.bf16.msra.mxu0 %v2448_v13 }
 0x3ce   : > { %v1347_v14 = vpop.f32.mrf.mxu1 }
 0x3cf   : > { %v1348_v15 = vadd.f32 %v3047_v41, %v1347_v14  ;;  %v2447_v14 = vld [vmem:[#allocation2 + $0x1d0] sm:$0xff] }
 0x3d0   : > { %1717 = vmatpush.bf16.msra.mxu0 %v2447_v14 }
 0x3d1   : > { %v1369_v17 = vmax.f32 %v1348_v15, 0.0 }
 0x3d3   : > { %v1378_v44 = vpack.c.bf16 %v1369_v17, %v1368_v16  ;;  %v2446_v16 = vld [vmem:[#allocation2 + $0x1c8] sm:$0xff] }
 0x3d4   : > { %1718 = vmatpush.bf16.msra.mxu0 %v2446_v16 }
 0x3d5   : > { %1476 = vmatmul.bf16.gmra.mxu2 %v1378_v44 }
 0x3d6   : > { %v1350_v20 = vpop.f32.mrf.mxu1 }
 0x3d7   : > { %v1351_v48 = vadd.f32 %v3047_v41, %v1350_v20 }
 0x3d9   : > { %v1370_v24 = vmax.f32 %v1351_v48, 0.0 }
 0x3de   : > { %v1352_v22 = vpop.f32.mrf.mxu1 }
 0x3df   : > { %v1353_v23 = vadd.f32 %v3047_v41, %v1352_v22 }
 0x3e1   : > { %v1371_v25 = vmax.f32 %v1353_v23, 0.0 }
 0x3e3   : > { %v1379_v26 = vpack.c.bf16 %v1371_v25, %v1370_v24 }
 0x3e5   : > { %1481 = vmatmul.bf16.gmra.mxu2 %v1379_v26 }
 0x3e6   : > { %v1355_v49 = vpop.f32.mrf.mxu1 }
 0x3e7   : > { %v1356_v27 = vadd.f32 %v3047_v41, %v1355_v49 }
 0x3e9   : > { %v1372_v30 = vmax.f32 %v1356_v27, 0.0  ;;  %v2445_v27 = vld [vmem:[#allocation2 + $0x1c0] sm:$0xff] }
 0x3ea   : > { %1719 = vmatpush.bf16.msra.mxu0 %v2445_v27 }
 0x3ee   : > { %v1357_v28 = vpop.f32.mrf.mxu1 }
 0x3ef   : > { %v1358_v29 = vadd.f32 %v3047_v41, %v1357_v28 }
 0x3f1   : > { %v1373_v31 = vmax.f32 %v1358_v29, 0.0  ;;  %v3085_v29 = vld [vmem:[%s3166_s6 + $0x7] ss:$0 sm:$0xff] }
 0x3f3   : > { %v1380_v32 = vpack.c.bf16 %v1373_v31, %v1372_v30 }
 0x3f5   : > { %1486 = vmatmul.bf16.gmra.mxu2 %v1380_v32 }
 0x418   : > { %v1457_v50 = vpop.f32.mrf.mxu2 }
 0x419   : > { %v1458_v35 = vadd.f32 %v3066_v34, %v1457_v50 }
 0x41b   : > { %v1492_v38 = vmax.f32 %v1458_v35, 0.0  ;;  %v2460_v35 = vld [vmem:[#allocation5 + $0x38] sm:$0xff] }
 0x41c   : > { %1843 = vmatpush.bf16.msra.mxu1 %v2460_v35 }
 0x420   : > { %v1459_v36 = vpop.f32.mrf.mxu2 }
 0x421   : > { %v1460_v37 = vadd.f32 %v3066_v34, %v1459_v36 }
 0x423   : > { %v1493_v40 = vmax.f32 %v1460_v37, 0.0 }
 0x425   : > { %v1506_v41 = vpack.c.bf16 %v1493_v40, %v1492_v38 }
 0x427   : > { %1588 = vmatmul.bf16.vlgmr.msra.gmra.mxu3 %v1506_v41 }
 0x428   : > { %v1462_v42 = vpop.f32.mrf.mxu2 }
 0x429   : > { %v1463_v46 = vadd.f32 %v3066_v34, %v1462_v42 }
 0x42b   : > { %v1494_v56 = vmax.f32 %v1463_v46, 0.0  ;;  %v2459_v46 = vld [vmem:[#allocation5 + $0x30] sm:$0xff] }
 0x42c   : > { %1844 = vmatpush.bf16.msra.mxu1 %v2459_v46 }
 0x430   : > { %v1464_v47 = vpop.f32.mrf.mxu2 }
 0x431   : > { %v1465_v51 = vadd.f32 %v3066_v34, %v1464_v47 }
 0x433   : > { %v1495_v57 = vmax.f32 %v1465_v51, 0.0  ;;  %v2458_v51 = vld [vmem:[#allocation5 + $0x28] sm:$0xff] }
 0x434   : > { %1845 = vmatpush.bf16.msra.mxu1 %v2458_v51 }
 0x435   : > { %v1507_v59 = vpack.c.bf16 %v1495_v57, %v1494_v56 }
 0x437   : > { %1593 = vmatmul.bf16.gmra.mxu3 %v1507_v59 }
 0x438   : > { %v1467_v53 = vpop.f32.mrf.mxu2 }
 0x439   : > { %v1468_v61 = vadd.f32 %v3066_v34, %v1467_v53 }
 0x43b   : > { %v1496_v0 = vmax.f32 %v1468_v61, 0.0 }
 0x440   : > { %v1469_v62 = vpop.f32.mrf.mxu2 }
 0x441   : > { %v1470_v63 = vadd.f32 %v3066_v34, %v1469_v62 }
 0x443   : > { %v1497_v43 = vmax.f32 %v1470_v63, 0.0  ;;  %v2457_v63 = vld [vmem:[#allocation5 + $0x20] sm:$0xff] }
 0x444   : > { %1846 = vmatpush.bf16.msra.mxu1 %v2457_v63 }
 0x445   : > { %v1508_v1 = vpack.c.bf16 %v1497_v43, %v1496_v0 }
 0x447   : > { %1598 = vmatmul.bf16.gmra.mxu3 %v1508_v1 }
 0x448   : > { %v1472_v2 = vpop.f32.mrf.mxu2 }
 0x449   : > { %v1473_v4 = vadd.f32 %v3066_v34, %v1472_v2 }
 0x44b   : > { %v1498_v52 = vmax.f32 %v1473_v4, 0.0 }
 0x450   : > { %v1474_v5 = vpop.f32.mrf.mxu2 }
 0x451   : > { %v1475_v6 = vadd.f32 %v3066_v34, %v1474_v5 }
 0x453   : > { %v1499_v54 = vmax.f32 %v1475_v6, 0.0  ;;  %v2456_v6 = vld [vmem:[#allocation5 + $0x18] sm:$0xff] }
 0x454   : > { %1847 = vmatpush.bf16.msra.mxu1 %v2456_v6 }
 0x455   : > { %v1509_v55 = vpack.c.bf16 %v1499_v54, %v1498_v52 }
 0x457   : > { %1603 = vmatmul.bf16.gmra.mxu3 %v1509_v55 }
 0x458   : > { %v1477_v7 = vpop.f32.mrf.mxu2 }
 0x459   : > { %v1478_v8 = vadd.f32 %v3066_v34, %v1477_v7 }
 0x45b   : > { %v1500_v11 = vmax.f32 %v1478_v8, 0.0 }
 0x460   : > { %v1479_v9 = vpop.f32.mrf.mxu2 }
 0x461   : > { %v1480_v10 = vadd.f32 %v3066_v34, %v1479_v9  ;;  %v2455_v9 = vld [vmem:[#allocation5 + $0x10] sm:$0xff] }
 0x462   : > { %1848 = vmatpush.bf16.msra.mxu1 %v2455_v9 }
 0x463   : > { %v1501_v3 = vmax.f32 %v1480_v10, 0.0 }
 0x465   : > { %v1510_v12 = vpack.c.bf16 %v1501_v3, %v1500_v11  ;;  %v2454_v11 = vld [vmem:[#allocation5 + $0x8] sm:$0xff] }
 0x466   : > { %1849 = vmatpush.bf16.msra.mxu1 %v2454_v11 }
 0x467   : > { %1608 = vmatmul.bf16.gmra.mxu3 %v1510_v12 }
 0x468   : > { %v1482_v15 = vpop.f32.mrf.mxu2 }
 0x469   : > { %v1483_v17 = vadd.f32 %v3066_v34, %v1482_v15 }
 0x46b   : > { %v1502_v19 = vmax.f32 %v1483_v17, 0.0 }
 0x470   : > { %v1484_v44 = vpop.f32.mrf.mxu2 }
 0x471   : > { %v1485_v18 = vadd.f32 %v3066_v34, %v1484_v44 }
 0x473   : > { %v1503_v20 = vmax.f32 %v1485_v18, 0.0 }
 0x475   : > { %v1511_v21 = vpack.c.bf16 %v1503_v20, %v1502_v19 }
 0x477   : > { %1613 = vmatmul.bf16.gmra.mxu3 %v1511_v21 }
 0x478   : > { %v1487_v48 = vpop.f32.mrf.mxu2 }
 0x479   : > { %v1488_v22 = vadd.f32 %v3066_v34, %v1487_v48 }
 0x47b   : > { %v1504_v25 = vmax.f32 %v1488_v22, 0.0  ;;  %v2453_v22 = vld [vmem:[#allocation5] sm:$0xff] }
 0x47c   : > { %1850 = vmatpush.bf16.msra.mxu1 %v2453_v22 }
 0x480   : > { %v1489_v23 = vpop.f32.mrf.mxu2 }
 0x481   : > { %v1490_v24 = vadd.f32 %v3066_v34, %v1489_v23 }
 0x483   : > { %v1505_v26 = vmax.f32 %v1490_v24, 0.0  ;;  %v2569_v24 = vld [vmem:[%s3166_s6 + $0x8] ss:$0 sm:$0xff] }
 0x485   : > { %v1512_v49 = vpack.c.bf16 %v1505_v26, %v1504_v25 }
 0x487   : > { %1618 = vmatmul.bf16.gmra.mxu3 %v1512_v49 }
 0x4aa   : > { %v1589_v28 = vpop.f32.mrf.mxu3 }
 0x4ab   : > { %v1590_v30 = vadd.f32 %v3085_v29, %v1589_v28 }
 0x4ad   : > { %v1624_v33 = vmax.f32 %v1590_v30, 0.0 }
 0x4b2   : > { %v1591_v31 = vpop.f32.mrf.mxu3 }
 0x4b3   : > { %v1592_v32 = vadd.f32 %v3085_v29, %v1591_v31 }
 0x4b5   : > { %v1625_v50 = vmax.f32 %v1592_v32, 0.0 }
 0x4b7   : > { %v1638_v34 = vpack.c.bf16 %v1625_v50, %v1624_v33 }
 0x4b9   : > { %1720 = vmatmul.bf16.vlgmr.msra.gmra.mxu0 %v1638_v34 }
 0x4ba   : > { %v1594_v36 = vpop.f32.mrf.mxu3 }
 0x4bb   : > { %v1595_v37 = vadd.f32 %v3085_v29, %v1594_v36 }
 0x4bd   : > { %v1626_v41 = vmax.f32 %v1595_v37, 0.0 }
 0x4c2   : > { %v1596_v38 = vpop.f32.mrf.mxu3 }
 0x4c3   : > { %v1597_v40 = vadd.f32 %v3085_v29, %v1596_v38 }
 0x4c5   : > { %v1627_v42 = vmax.f32 %v1597_v40, 0.0 }
 0x4c7   : > { %v1639_v45 = vpack.c.bf16 %v1627_v42, %v1626_v41 }
 0x4c9   : > { %1725 = vmatmul.bf16.gmra.mxu0 %v1639_v45 }
 0x4ca   : > { %v1599_v47 = vpop.f32.mrf.mxu3 }
 0x4cb   : > { %v1600_v56 = vadd.f32 %v3085_v29, %v1599_v47 }
 0x4cd   : > { %v1628_v39 = vmax.f32 %v1600_v56, 0.0 }
 0x4d2   : > { %v1601_v57 = vpop.f32.mrf.mxu3 }
 0x4d3   : > { %v1602_v59 = vadd.f32 %v3085_v29, %v1601_v57 }
 0x4d5   : > { %v1629_v53 = vmax.f32 %v1602_v59, 0.0 }
 0x4d7   : > { %v1640_v61 = vpack.c.bf16 %v1629_v53, %v1628_v39 }
 0x4d9   : > { %1730 = vmatmul.bf16.gmra.mxu0 %v1640_v61 }
 0x4da   : > { %v1604_v62 = vpop.f32.mrf.mxu3 }
 0x4db   : > { %v1605_v0 = vadd.f32 %v3085_v29, %v1604_v62 }
 0x4dd   : > { %v1630_v58 = vmax.f32 %v1605_v0, 0.0 }
 0x4e2   : > { %v1606_v43 = vpop.f32.mrf.mxu3 }
 0x4e3   : > { %v1607_v1 = vadd.f32 %v3085_v29, %v1606_v43 }
 0x4e5   : > { %v1631_v2 = vmax.f32 %v1607_v1, 0.0 }
 0x4e7   : > { %v1641_v4 = vpack.c.bf16 %v1631_v2, %v1630_v58 }
 0x4e9   : > { %1735 = vmatmul.bf16.gmra.mxu0 %v1641_v4 }
 0x4ea   : > { %v1609_v5 = vpop.f32.mrf.mxu3 }
 0x4eb   : > { %v1610_v52 = vadd.f32 %v3085_v29, %v1609_v5 }
 0x4ed   : > { %v1632_v60 = vmax.f32 %v1610_v52, 0.0 }
 0x4f2   : > { %v1611_v54 = vpop.f32.mrf.mxu3 }
 0x4f3   : > { %v1612_v55 = vadd.f32 %v3085_v29, %v1611_v54 }
 0x4f5   : > { %v1633_v7 = vmax.f32 %v1612_v55, 0.0 }
 0x4f7   : > { %v1642_v8 = vpack.c.bf16 %v1633_v7, %v1632_v60 }
 0x4f9   : > { %1740 = vmatmul.bf16.gmra.mxu0 %v1642_v8 }
 0x4fa   : > { %v1614_v10 = vpop.f32.mrf.mxu3 }
 0x4fb   : > { %v1615_v3 = vadd.f32 %v3085_v29, %v1614_v10 }
 0x4fd   : > { %v1634_v14 = vmax.f32 %v1615_v3, 0.0  ;;  %v2570_v3 = vld [vmem:[%s3166_s6 + $0x9] ss:$0 sm:$0xff] }
 0x502   : > { %v1616_v12 = vpop.f32.mrf.mxu3 }
 0x503   : > { %v1617_v13 = vadd.f32 %v3085_v29, %v1616_v12 }
 0x505   : > { %v1635_v15 = vmax.f32 %v1617_v13, 0.0 }
 0x507   : > { %v1643_v16 = vpack.c.bf16 %v1635_v15, %v1634_v14 }
 0x509   : > { %1745 = vmatmul.bf16.gmra.mxu0 %v1643_v16 }
 0x50a   : > { %v1619_v17 = vpop.f32.mrf.mxu3 }
 0x50b   : > { %v1620_v44 = vadd.f32 %v3085_v29, %v1619_v17 }
 0x50d   : > { %v1636_v20 = vmax.f32 %v1620_v44, 0.0 }
 0x512   : > { %v1621_v18 = vpop.f32.mrf.mxu3 }
 0x513   : > { %v1622_v19 = vadd.f32 %v3085_v29, %v1621_v18 }
 0x515   : > { %v1637_v21 = vmax.f32 %v1622_v19, 0.0 }
 0x517   : > { %v1644_v48 = vpack.c.bf16 %v1637_v21, %v1636_v20 }
 0x519   : > { %1750 = vmatmul.bf16.gmra.mxu0 %v1644_v48 }
 0x536   : > { %v1721_v23 = vpop.f32.mrf.mxu0 }
 0x537   : > { %v1722_v25 = vadd.f32 %v2569_v24, %v1721_v23 }
 0x539   : > { %v1756_v27 = vmax.f32 %v1722_v25, 0.0 }
 0x53e   : > { %v1723_v26 = vpop.f32.mrf.mxu0 }
 0x53f   : > { %v1724_v49 = vadd.f32 %v2569_v24, %v1723_v26 }
 0x541   : > { %v1757_v28 = vmax.f32 %v1724_v49, 0.0 }
 0x543   : > { %v1770_v30 = vpack.c.bf16 %v1757_v28, %v1756_v27 }
 0x545   : > { %1851 = vmatmul.bf16.vlgmr.msra.gmra.mxu1 %v1770_v30 }
 0x546   : > { %v1726_v31 = vpop.f32.mrf.mxu0 }
 0x547   : > { %v1727_v29 = vadd.f32 %v2569_v24, %v1726_v31 }
 0x549   : > { %v1758_v50 = vmax.f32 %v1727_v29, 0.0 }
 0x54e   : > { %v1728_v32 = vpop.f32.mrf.mxu0 }
 0x54f   : > { %v1729_v33 = vadd.f32 %v2569_v24, %v1728_v32 }
 0x551   : > { %v1759_v34 = vmax.f32 %v1729_v33, 0.0 }
 0x553   : > { %v1771_v35 = vpack.c.bf16 %v1759_v34, %v1758_v50 }
 0x555   : > { %1856 = vmatmul.bf16.gmra.mxu1 %v1771_v35 }
 0x556   : > { %v1731_v36 = vpop.f32.mrf.mxu0 }
 0x557   : > { %v1732_v37 = vadd.f32 %v2569_v24, %v1731_v36 }
 0x559   : > { %v1760_v41 = vmax.f32 %v1732_v37, 0.0 }
 0x55e   : > { %v1733_v38 = vpop.f32.mrf.mxu0 }
 0x55f   : > { %v1734_v40 = vadd.f32 %v2569_v24, %v1733_v38 }
 0x561   : > { %v1761_v42 = vmax.f32 %v1734_v40, 0.0 }
 0x563   : > { %v1772_v45 = vpack.c.bf16 %v1761_v42, %v1760_v41 }
 0x565   : > { %1861 = vmatmul.bf16.gmra.mxu1 %v1772_v45 }
 0x566   : > { %v1736_v46 = vpop.f32.mrf.mxu0 }
 0x567   : > { %v1737_v47 = vadd.f32 %v2569_v24, %v1736_v46 }
 0x569   : > { %v1762_v57 = vmax.f32 %v1737_v47, 0.0 }
 0x56e   : > { %v1738_v51 = vpop.f32.mrf.mxu0 }
 0x56f   : > { %v1739_v56 = vadd.f32 %v2569_v24, %v1738_v51 }
 0x571   : > { %v1763_v59 = vmax.f32 %v1739_v56, 0.0 }
 0x573   : > { %v1773_v39 = vpack.c.bf16 %v1763_v59, %v1762_v57 }
 0x575   : > { %1866 = vmatmul.bf16.gmra.mxu1 %v1773_v39 }
 0x576   : > { %v1741_v53 = vpop.f32.mrf.mxu0 }
 0x577   : > { %v1742_v61 = vadd.f32 %v2569_v24, %v1741_v53 }
 0x579   : > { %v1764_v0 = vmax.f32 %v1742_v61, 0.0 }
 0x57e   : > { %v1743_v62 = vpop.f32.mrf.mxu0 }
 0x57f   : > { %v1744_v63 = vadd.f32 %v2569_v24, %v1743_v62 }
 0x581   : > { %v1765_v43 = vmax.f32 %v1744_v63, 0.0 }
 0x583   : > { %v1774_v1 = vpack.c.bf16 %v1765_v43, %v1764_v0 }
 0x585   : > { %1871 = vmatmul.bf16.gmra.mxu1 %v1774_v1 }
 0x586   : > { %v1746_v58 = vpop.f32.mrf.mxu0 }
 0x587   : > { %v1747_v2 = vadd.f32 %v2569_v24, %v1746_v58 }
 0x589   : > { %v1766_v6 = vmax.f32 %v1747_v2, 0.0 }
 0x58e   : > { %v1748_v4 = vpop.f32.mrf.mxu0 }
 0x58f   : > { %v1749_v5 = vadd.f32 %v2569_v24, %v1748_v4 }
 0x591   : > { %v1767_v52 = vmax.f32 %v1749_v5, 0.0 }
 0x593   : > { %v1775_v54 = vpack.c.bf16 %v1767_v52, %v1766_v6 }
 0x595   : > { %1876 = vmatmul.bf16.gmra.mxu1 %v1775_v54 }
 0x596   : > { %v1751_v55 = vpop.f32.mrf.mxu0 }
 0x597   : > { %v1752_v60 = vadd.f32 %v2569_v24, %v1751_v55 }
 0x599   : > { %v1768_v9 = vmax.f32 %v1752_v60, 0.0 }
 0x59e   : > { %v1753_v7 = vpop.f32.mrf.mxu0 }
 0x59f   : > { %v1754_v8 = vadd.f32 %v2569_v24, %v1753_v7 }
 0x5a1   : > { %v1769_v10 = vmax.f32 %v1754_v8, 0.0 }
 0x5a3   : > { %v1776_v11 = vpack.c.bf16 %v1769_v10, %v1768_v9 }
 0x5a5   : > { %1881 = vmatmul.bf16.gmra.mxu1 %v1776_v11 }
 0x5c2   : > { %v1852_v12 = vpop.f32.mrf.mxu1 }
 0x5c3   : > { %v1853_v13 = vadd.f32 %v2570_v3, %v1852_v12 }
 0x5c5   : > { %1887 = vst [vmem:[%s3110_s21] sm:$0xff] %v1853_v13 }
 0x5ca   : > { %v1854_v14 = vpop.f32.mrf.mxu1 }
 0x5cb   : > { %v1855_v15 = vadd.f32 %v2570_v3, %v1854_v14 }
 0x5cd   : > { %1888 = vst [vmem:[%s3110_s21 + $0x8] sm:$0xff] %v1855_v15 }
 0x5d2   : > { %v1857_v16 = vpop.f32.mrf.mxu1 }
 0x5d3   : > { %v1858_v17 = vadd.f32 %v2570_v3, %v1857_v16 }
 0x5d5   : > { %1889 = vst [vmem:[%s3110_s21 + $0x10] sm:$0xff] %v1858_v17 }
 0x5da   : > { %v1859_v44 = vpop.f32.mrf.mxu1 }
 0x5db   : > { %v1860_v18 = vadd.f32 %v2570_v3, %v1859_v44 }
 0x5dd   : > { %1890 = vst [vmem:[%s3110_s21 + $0x18] sm:$0xff] %v1860_v18 }
 0x5e2   : > { %v1862_v19 = vpop.f32.mrf.mxu1 }
 0x5e3   : > { %v1863_v20 = vadd.f32 %v2570_v3, %v1862_v19 }
 0x5e5   : > { %1891 = vst [vmem:[%s3110_s21 + $0x20] sm:$0xff] %v1863_v20 }
 0x5ea   : > { %v1864_v21 = vpop.f32.mrf.mxu1 }
 0x5eb   : > { %v1865_v48 = vadd.f32 %v2570_v3, %v1864_v21 }
 0x5ed   : > { %1892 = vst [vmem:[%s3110_s21 + $0x28] sm:$0xff] %v1865_v48 }
 0x5f2   : > { %v1867_v22 = vpop.f32.mrf.mxu1 }
 0x5f3   : > { %v1868_v23 = vadd.f32 %v2570_v3, %v1867_v22 }
 0x5f5   : > { %1893 = vst [vmem:[%s3110_s21 + $0x30] sm:$0xff] %v1868_v23 }
 0x5fa   : > { %v1869_v24 = vpop.f32.mrf.mxu1 }
 0x5fb   : > { %v1870_v25 = vadd.f32 %v2570_v3, %v1869_v24 }
 0x5fd   : > { %1894 = vst [vmem:[%s3110_s21 + $0x38] sm:$0xff] %v1870_v25 }
 0x602   : > { %v1872_v26 = vpop.f32.mrf.mxu1 }
 0x603   : > { %v1873_v49 = vadd.f32 %v2570_v3, %v1872_v26 }
 0x605   : > { %1895 = vst [vmem:[%s3110_s21 + $0x40] sm:$0xff] %v1873_v49 }
 0x60a   : > { %v1874_v27 = vpop.f32.mrf.mxu1 }
 0x60b   : > { %v1875_v28 = vadd.f32 %v2570_v3, %v1874_v27 }
 0x60d   : > { %1896 = vst [vmem:[%s3110_s21 + $0x48] sm:$0xff] %v1875_v28 }
 0x612   : > { %v1877_v30 = vpop.f32.mrf.mxu1 }
 0x613   : > { %v1878_v31 = vadd.f32 %v2570_v3, %v1877_v30 }
 0x615   : > { %1897 = vst [vmem:[%s3110_s21 + $0x50] sm:$0xff] %v1878_v31 }
 0x61a   : > { %v1879_v29 = vpop.f32.mrf.mxu1 }
 0x61b   : > { %v1880_v32 = vadd.f32 %v2570_v3, %v1879_v29 }
 0x61d   : > { %1898 = vst [vmem:[%s3110_s21 + $0x58] sm:$0xff] %v1880_v32 }
 0x622   : > { %v1882_v33 = vpop.f32.mrf.mxu1 }
 0x623   : > { %v1883_v50 = vadd.f32 %v2570_v3, %v1882_v33 }
 0x625   : > { %1899 = vst [vmem:[%s3110_s21 + $0x60] sm:$0xff] %v1883_v50 }
 0x62a   : > { %v1884_v34 = vpop.f32.mrf.mxu1 }
 0x62b   : > { %v1885_v35 = vadd.f32 %v2570_v3, %v1884_v34 }
 0x62d   : > { %1900 = vst [vmem:[%s3110_s21 + $0x68] sm:$0xff] %v1885_v35 }
 0x62e   : > { %2658 = shalt.err (!%p2655_p8)
}
 0x62f   : > { %s2709_s16 = smov 128   ;;  %s2710_s21 = smov 8  }
 0x630   : > { %2487 = dma.vmem_to_hbm [thread:$0]  (%p2789_p5), %s1915_s18, 1792, %s1917_s8, %s1902_s13, %s2709_s16, %s2709_s16, %s2710_s21  }
 0x631 PF: > { %p2504_p9 = scmp.ge.s32.totalorder %s2701_s27, 2  ;;  %s1931_s23 = sand.u32 1, %s2689_s24  }
 0x632   : > { %s1932_s29 = scalar_lea.sflag [#allocation4], %s1931_s23 }
 0x633   : > { %p2497_p10 = pnand %p2504_p9, %p2793_p6 }
 0x635   : > { %p2498_p11 = pneg %p2497_p10 }
 0x637   : > { %2684 = dma.done.wait (%p2498_p11), %s1932_s29, 1792  }
 0x638   : > { %2686 = vsyncadd (%p2498_p11), %s1932_s29, 4294965504  ;;  %p19_p12 = scmp.ge.s32.totalorder %s2776_s30, 4   ;;  %s3171_s24 = smov %s2693_s25 }
 0x639   : > { %s3172_s25 = smov %s2697_s26  ;;  %s3173_s26 = smov %s2787_s10 }
 0x63a   : > { %s3174_s27 = smov %s2776_s30  ;;  %21 = sbr.rel (!%p19_p12) target bundleno = 5 (0x5), region = 102 }
 0x63f   :  { %1938 = vsyncpa [#allocation3], 1 }
 0x640   :  { %1940 = vsyncpa [#allocation3 + $0x1], 1 }
 0x641   :  { %1941 = vsyncpa [#allocation6], 1 }
 0x642   :  { %1942 = vsyncpa [#allocation4], 1 }
 0x643   :  { %1944 = vsyncpa [#allocation4 + $0x1], 1 }

</bundles_post_ra>
